<compile_context>
chip_gen: v5e
topology: v5e:2x2
jax: 0.10.0
libtpu: 0.0.40
codegen_flags: <defaults>
</compile_context>

<pallas_src>
import jax
import jax.numpy as jnp
from jax.experimental import pallas as pl
from jax.experimental.pallas import tpu as pltpu


def _round_up(x, m):
    return (x + m - 1) // m * m


def basic_conv2d(x, weight, gamma, beta, *, stride=1, padding=1, eps=1e-3):
    """x: (N, C_in, H, W) NCHW; weight: (C_out, C_in, KH, KW). Returns NCHW f32."""
    n, c_in, h, w = x.shape
    c_out, _, kh, kw = weight.shape
    h_out = (h + 2 * padding - kh) // stride + 1
    w_out = (w + 2 * padding - kw) // stride + 1
    rows = h_out * w_out
    inv_rows = 1.0 / rows
    h_pad = h + 2 * padding
    w_pad = w + 2 * padding

    # Lane-dense matmul N dim.  NOTE: on v6e/v7x (2x256x256 MXU) pad to a
    # multiple of 256 once c_out >= 128; keep 128 for small c_out (mem-bound)
    # and on v5e (128-wide MXU).
    c_out_pad = _round_up(c_out, 128)

    # NHWC + spatial zero-pad ONCE, bf16 (halves HBM read traffic; MXU inputs
    # are bf16 with f32 accumulation).  No im2col materialization.
    x_nhwc = jnp.pad(
        x.transpose(0, 2, 3, 1).astype(jnp.bfloat16),
        ((0, 0), (padding, padding), (padding, padding), (0, 0)))

    # Weight taps laid out as (KH, KW, C_in, C_out_pad); padded channels are 0.
    w_k = jnp.zeros((kh, kw, c_in, c_out_pad), jnp.bfloat16)
    w_k = w_k.at[..., :c_out].set(weight.transpose(2, 3, 1, 0).astype(jnp.bfloat16))

    # ---- fused conv helper (shared by both passes) -------------------------
    def conv_accum(x_ref, w_ref):
        xt = x_ref[0]                                        # (H_pad, W_pad, C_in) bf16
        acc = None
        for i in range(kh):
            for j in range(kw):
                patch = xt[i:i + stride * (h_out - 1) + 1:stride,
                           j:j + stride * (w_out - 1) + 1:stride, :]   # (Ho, Wo, C_in)
                lhs = patch.reshape(rows, c_in)
                y = jnp.dot(lhs, w_ref[i, j], preferred_element_type=jnp.float32)
                acc = y if acc is None else acc + y
        return acc                                           # (rows, C_out_pad) f32

    # ---- pass 1: per-image (mean, M2) partial BN statistics ----------------
    def stats_kernel(x_ref, w_ref, mean_ref, m2_ref):
        y = conv_accum(x_ref, w_ref)
        mu = jnp.sum(y, axis=0, keepdims=True) * inv_rows    # (1, C_out_pad)
        d = y - mu
        mean_ref[0] = mu
        m2_ref[0] = jnp.sum(d * d, axis=0, keepdims=True)

    # ---- pass 2: fused conv recompute + folded BN affine + ReLU ------------
    def apply_kernel(x_ref, w_ref, scale_ref, bias_ref, out_ref):
        y = conv_accum(x_ref, w_ref)
        z = jnp.maximum(y * scale_ref[...] + bias_ref[...], 0.0)
        out_ref[...] = z[:, :c_out].astype(out_ref.dtype)    # only real channels stored

    cparams = pltpu.CompilerParams(
        dimension_semantics=("parallel",),          # batch axis -> both TCs when N >= 2
        vmem_limit_bytes=32 * 1024 * 1024)

    tile_mean, tile_m2 = pl.pallas_call(
        stats_kernel,
        out_shape=(jax.ShapeDtypeStruct((n, 1, c_out_pad), jnp.float32),
                   jax.ShapeDtypeStruct((n, 1, c_out_pad), jnp.float32)),
        grid=(n,),
        in_specs=[
            pl.BlockSpec((1, h_pad, w_pad, c_in), lambda i: (i, 0, 0, 0)),
            pl.BlockSpec((kh, kw, c_in, c_out_pad), lambda i: (0, 0, 0, 0)),
        ],
        out_specs=(pl.BlockSpec((1, 1, c_out_pad), lambda i: (i, 0, 0)),
                   pl.BlockSpec((1, 1, c_out_pad), lambda i: (i, 0, 0))),
        compiler_params=cparams,
    )(x_nhwc, w_k)

    # Exact training-mode BN stats from per-tile (mean, M2); all tiles have the
    # same count (rows), so the combine is the standard decomposition
    #   M2_total = sum_i M2_i + rows * sum_i (m_i - mu)^2   (no cancellation).
    tile_mean = tile_mean[:, 0, :]                           # (n, c_out_pad)
    tile_m2 = tile_m2[:, 0, :]
    mean = jnp.mean(tile_mean, axis=0)
    m2 = jnp.sum(tile_m2, axis=0) + rows * jnp.sum((tile_mean - mean[None, :]) ** 2, axis=0)
    var = m2 / (n * rows)                                    # biased variance (training mode)
    inv_std = jax.lax.rsqrt(var + eps)

    gamma_p = jnp.zeros((c_out_pad,), jnp.float32).at[:c_out].set(gamma.astype(jnp.float32))
    beta_p = jnp.zeros((c_out_pad,), jnp.float32).at[:c_out].set(beta.astype(jnp.float32))
    scale = (gamma_p * inv_std).reshape(1, c_out_pad)
    bias = (beta_p - mean * gamma_p * inv_std).reshape(1, c_out_pad)

    out_flat = pl.pallas_call(
        apply_kernel,
        out_shape=jax.ShapeDtypeStruct((n * rows, c_out), jnp.float32),
        grid=(n,),
        in_specs=[
            pl.BlockSpec((1, h_pad, w_pad, c_in), lambda i: (i, 0, 0, 0)),
            pl.BlockSpec((kh, kw, c_in, c_out_pad), lambda i: (0, 0, 0, 0)),
            pl.BlockSpec((1, c_out_pad), lambda i: (0, 0)),
            pl.BlockSpec((1, c_out_pad), lambda i: (0, 0)),
        ],
        out_specs=pl.BlockSpec((rows, c_out), lambda i: (i, 0)),
        compiler_params=cparams,
    )(x_nhwc, w_k, scale, bias)

    # (N*Ho*Wo, C_out) -> NCHW
    return out_flat.reshape(n, h_out, w_out, c_out).transpose(0, 3, 1, 2)


def _reference(x, weight, gamma, beta, *, stride=1, padding=1, eps=1e-3):
    y = jax.lax.conv_general_dilated(
        x, weight, window_strides=(stride, stride),
        padding=[(padding, padding), (padding, padding)],
        dimension_numbers=("NCHW", "OIHW", "NCHW"))
    mean = jnp.mean(y, axis=(0, 2, 3), keepdims=True)
    var = jnp.mean((y - mean) ** 2, axis=(0, 2, 3), keepdims=True)
    z = (y - mean) * jax.lax.rsqrt(var + eps)
    z = z * gamma.reshape(1, -1, 1, 1) + beta.reshape(1, -1, 1, 1)
    return jnp.maximum(z, 0.0)


if __name__ == "__main__":
    # BasicConv2d(in_channels=4, out_channels=8, kernel_size=3, padding=1)
    key = jax.random.PRNGKey(0)
    k_x, k_w, k_g, k_b = jax.random.split(key, 4)

    N, C_IN, H, W = 2, 4, 16, 16
    C_OUT, KH, KW = 8, 3, 3

    x = jax.random.normal(k_x, (N, C_IN, H, W), dtype=jnp.float32)
    weight = jax.random.normal(k_w, (C_OUT, C_IN, KH, KW), dtype=jnp.float32) * 0.1
    gamma = jax.random.uniform(k_g, (C_OUT,), dtype=jnp.float32, minval=0.5, maxval=1.5)
    beta = jax.random.normal(k_b, (C_OUT,), dtype=jnp.float32) * 0.1

    out = basic_conv2d(x, weight, gamma, beta, stride=1, padding=1)
    jax.block_until_ready(out)
    assert out.shape == (N, C_OUT, H, W)

    # Loose sanity check vs f32 reference (kernel uses bf16 inputs on the MXU).
    ref = _reference(x, weight, gamma, beta, stride=1, padding=1)
    max_err = float(jnp.max(jnp.abs(out - ref)))
    assert max_err < 5e-2, f"max abs err {max_err}"
    print("KERNEL_OK")
</pallas_src>

<mosaic_0001>
module attributes {stable_mosaic.version = 11 : i64} {
  func.func @stats_kernel(%arg0: i32, %arg1: memref<1x18x18x4xbf16, #tpu.memory_space<vmem>>, %arg2: memref<3x3x4x128xbf16, #tpu.memory_space<vmem>>, %arg3: memref<1x1x128xf32, #tpu.memory_space<vmem>>, %arg4: memref<1x1x128xf32, #tpu.memory_space<vmem>>) attributes {dimension_semantics = [#tpu.dimension_semantics<parallel>], iteration_bounds = array<i64: 2>, scalar_prefetch = 0 : i64, scratch_operands = 0 : i64, tpu.core_type = #tpu.core_type<tc>, window_params = [{transform_indices = @transform_0, window_bounds = array<i64: 1, 18, 18, 4>}, {pipeline_mode = #tpu.pipeline_mode<synchronous>, transform_indices = @transform_1, window_bounds = array<i64: 3, 3, 4, 128>}, {transform_indices = @transform_2, window_bounds = array<i64: 1, 1, 128>}, {transform_indices = @transform_3, window_bounds = array<i64: 1, 1, 128>}]} {
    %c0 = arith.constant 0 : index
    %c0_0 = arith.constant 0 : index
    %c0_1 = arith.constant 0 : index
    %c0_2 = arith.constant 0 : index
    %0 = vector.load %arg1[%c0, %c0_0, %c0_1, %c0_2] : memref<1x18x18x4xbf16, #tpu.memory_space<vmem>>, vector<1x18x18x4xbf16>
    %1 = vector.shape_cast %0 : vector<1x18x18x4xbf16> to vector<18x18x4xbf16>
    %2 = vector.extract_strided_slice %1 {offsets = [0, 0, 0], sizes = [16, 16, 4], strides = [1, 1, 1]} : vector<18x18x4xbf16> to vector<16x16x4xbf16>
    %3 = vector.shape_cast %2 : vector<16x16x4xbf16> to vector<256x4xbf16>
    %c0_3 = arith.constant 0 : index
    %c0_4 = arith.constant 0 : index
    %c0_5 = arith.constant 0 : index
    %c0_6 = arith.constant 0 : index
    %4 = vector.load %arg2[%c0_3, %c0_4, %c0_5, %c0_6] : memref<3x3x4x128xbf16, #tpu.memory_space<vmem>>, vector<1x1x4x128xbf16>
    %5 = vector.shape_cast %4 : vector<1x1x4x128xbf16> to vector<4x128xbf16>
    %cst = arith.constant dense<0.000000e+00> : vector<256x128xf32>
    %6 = tpu.matmul %3, %5, %cst {dimension_numbers = #tpu.dot_dimension_numbers<[1], [0], [0], [1], [0, 0, 1, 1], [], []>} : vector<256x4xbf16>, vector<4x128xbf16>, vector<256x128xf32> -> vector<256x128xf32>
    %7 = vector.extract_strided_slice %1 {offsets = [0, 1, 0], sizes = [16, 16, 4], strides = [1, 1, 1]} : vector<18x18x4xbf16> to vector<16x16x4xbf16>
    %8 = vector.shape_cast %7 : vector<16x16x4xbf16> to vector<256x4xbf16>
    %c0_7 = arith.constant 0 : index
    %c1 = arith.constant 1 : index
    %c0_8 = arith.constant 0 : index
    %c0_9 = arith.constant 0 : index
    %9 = vector.load %arg2[%c0_7, %c1, %c0_8, %c0_9] : memref<3x3x4x128xbf16, #tpu.memory_space<vmem>>, vector<1x1x4x128xbf16>
    %10 = vector.shape_cast %9 : vector<1x1x4x128xbf16> to vector<4x128xbf16>
    %cst_10 = arith.constant dense<0.000000e+00> : vector<256x128xf32>
    %11 = tpu.matmul %8, %10, %cst_10 {dimension_numbers = #tpu.dot_dimension_numbers<[1], [0], [0], [1], [0, 0, 1, 1], [], []>} : vector<256x4xbf16>, vector<4x128xbf16>, vector<256x128xf32> -> vector<256x128xf32>
    %12 = arith.addf %6, %11 : vector<256x128xf32>
    %13 = vector.extract_strided_slice %1 {offsets = [0, 2, 0], sizes = [16, 16, 4], strides = [1, 1, 1]} : vector<18x18x4xbf16> to vector<16x16x4xbf16>
    %14 = vector.shape_cast %13 : vector<16x16x4xbf16> to vector<256x4xbf16>
    %c0_11 = arith.constant 0 : index
    %c2 = arith.constant 2 : index
    %c0_12 = arith.constant 0 : index
    %c0_13 = arith.constant 0 : index
    %15 = vector.load %arg2[%c0_11, %c2, %c0_12, %c0_13] : memref<3x3x4x128xbf16, #tpu.memory_space<vmem>>, vector<1x1x4x128xbf16>
    %16 = vector.shape_cast %15 : vector<1x1x4x128xbf16> to vector<4x128xbf16>
    %cst_14 = arith.constant dense<0.000000e+00> : vector<256x128xf32>
    %17 = tpu.matmul %14, %16, %cst_14 {dimension_numbers = #tpu.dot_dimension_numbers<[1], [0], [0], [1], [0, 0, 1, 1], [], []>} : vector<256x4xbf16>, vector<4x128xbf16>, vector<256x128xf32> -> vector<256x128xf32>
    %18 = arith.addf %12, %17 : vector<256x128xf32>
    %19 = vector.extract_strided_slice %1 {offsets = [1, 0, 0], sizes = [16, 16, 4], strides = [1, 1, 1]} : vector<18x18x4xbf16> to vector<16x16x4xbf16>
    %20 = vector.shape_cast %19 : vector<16x16x4xbf16> to vector<256x4xbf16>
    %c1_15 = arith.constant 1 : index
    %c0_16 = arith.constant 0 : index
    %c0_17 = arith.constant 0 : index
    %c0_18 = arith.constant 0 : index
    %21 = vector.load %arg2[%c1_15, %c0_16, %c0_17, %c0_18] : memref<3x3x4x128xbf16, #tpu.memory_space<vmem>>, vector<1x1x4x128xbf16>
    %22 = vector.shape_cast %21 : vector<1x1x4x128xbf16> to vector<4x128xbf16>
    %cst_19 = arith.constant dense<0.000000e+00> : vector<256x128xf32>
    %23 = tpu.matmul %20, %22, %cst_19 {dimension_numbers = #tpu.dot_dimension_numbers<[1], [0], [0], [1], [0, 0, 1, 1], [], []>} : vector<256x4xbf16>, vector<4x128xbf16>, vector<256x128xf32> -> vector<256x128xf32>
    %24 = arith.addf %18, %23 : vector<256x128xf32>
    %25 = vector.extract_strided_slice %1 {offsets = [1, 1, 0], sizes = [16, 16, 4], strides = [1, 1, 1]} : vector<18x18x4xbf16> to vector<16x16x4xbf16>
    %26 = vector.shape_cast %25 : vector<16x16x4xbf16> to vector<256x4xbf16>
    %c1_20 = arith.constant 1 : index
    %c1_21 = arith.constant 1 : index
    %c0_22 = arith.constant 0 : index
    %c0_23 = arith.constant 0 : index
    %27 = vector.load %arg2[%c1_20, %c1_21, %c0_22, %c0_23] : memref<3x3x4x128xbf16, #tpu.memory_space<vmem>>, vector<1x1x4x128xbf16>
    %28 = vector.shape_cast %27 : vector<1x1x4x128xbf16> to vector<4x128xbf16>
    %cst_24 = arith.constant dense<0.000000e+00> : vector<256x128xf32>
    %29 = tpu.matmul %26, %28, %cst_24 {dimension_numbers = #tpu.dot_dimension_numbers<[1], [0], [0], [1], [0, 0, 1, 1], [], []>} : vector<256x4xbf16>, vector<4x128xbf16>, vector<256x128xf32> -> vector<256x128xf32>
    %30 = arith.addf %24, %29 : vector<256x128xf32>
    %31 = vector.extract_strided_slice %1 {offsets = [1, 2, 0], sizes = [16, 16, 4], strides = [1, 1, 1]} : vector<18x18x4xbf16> to vector<16x16x4xbf16>
    %32 = vector.shape_cast %31 : vector<16x16x4xbf16> to vector<256x4xbf16>
    %c1_25 = arith.constant 1 : index
    %c2_26 = arith.constant 2 : index
    %c0_27 = arith.constant 0 : index
    %c0_28 = arith.constant 0 : index
    %33 = vector.load %arg2[%c1_25, %c2_26, %c0_27, %c0_28] : memref<3x3x4x128xbf16, #tpu.memory_space<vmem>>, vector<1x1x4x128xbf16>
    %34 = vector.shape_cast %33 : vector<1x1x4x128xbf16> to vector<4x128xbf16>
    %cst_29 = arith.constant dense<0.000000e+00> : vector<256x128xf32>
    %35 = tpu.matmul %32, %34, %cst_29 {dimension_numbers = #tpu.dot_dimension_numbers<[1], [0], [0], [1], [0, 0, 1, 1], [], []>} : vector<256x4xbf16>, vector<4x128xbf16>, vector<256x128xf32> -> vector<256x128xf32>
    %36 = arith.addf %30, %35 : vector<256x128xf32>
    %37 = vector.extract_strided_slice %1 {offsets = [2, 0, 0], sizes = [16, 16, 4], strides = [1, 1, 1]} : vector<18x18x4xbf16> to vector<16x16x4xbf16>
    %38 = vector.shape_cast %37 : vector<16x16x4xbf16> to vector<256x4xbf16>
    %c2_30 = arith.constant 2 : index
    %c0_31 = arith.constant 0 : index
    %c0_32 = arith.constant 0 : index
    %c0_33 = arith.constant 0 : index
    %39 = vector.load %arg2[%c2_30, %c0_31, %c0_32, %c0_33] : memref<3x3x4x128xbf16, #tpu.memory_space<vmem>>, vector<1x1x4x128xbf16>
    %40 = vector.shape_cast %39 : vector<1x1x4x128xbf16> to vector<4x128xbf16>
    %cst_34 = arith.constant dense<0.000000e+00> : vector<256x128xf32>
    %41 = tpu.matmul %38, %40, %cst_34 {dimension_numbers = #tpu.dot_dimension_numbers<[1], [0], [0], [1], [0, 0, 1, 1], [], []>} : vector<256x4xbf16>, vector<4x128xbf16>, vector<256x128xf32> -> vector<256x128xf32>
    %42 = arith.addf %36, %41 : vector<256x128xf32>
    %43 = vector.extract_strided_slice %1 {offsets = [2, 1, 0], sizes = [16, 16, 4], strides = [1, 1, 1]} : vector<18x18x4xbf16> to vector<16x16x4xbf16>
    %44 = vector.shape_cast %43 : vector<16x16x4xbf16> to vector<256x4xbf16>
    %c2_35 = arith.constant 2 : index
    %c1_36 = arith.constant 1 : index
    %c0_37 = arith.constant 0 : index
    %c0_38 = arith.constant 0 : index
    %45 = vector.load %arg2[%c2_35, %c1_36, %c0_37, %c0_38] : memref<3x3x4x128xbf16, #tpu.memory_space<vmem>>, vector<1x1x4x128xbf16>
    %46 = vector.shape_cast %45 : vector<1x1x4x128xbf16> to vector<4x128xbf16>
    %cst_39 = arith.constant dense<0.000000e+00> : vector<256x128xf32>
    %47 = tpu.matmul %44, %46, %cst_39 {dimension_numbers = #tpu.dot_dimension_numbers<[1], [0], [0], [1], [0, 0, 1, 1], [], []>} : vector<256x4xbf16>, vector<4x128xbf16>, vector<256x128xf32> -> vector<256x128xf32>
    %48 = arith.addf %42, %47 : vector<256x128xf32>
    %49 = vector.extract_strided_slice %1 {offsets = [2, 2, 0], sizes = [16, 16, 4], strides = [1, 1, 1]} : vector<18x18x4xbf16> to vector<16x16x4xbf16>
    %50 = vector.shape_cast %49 : vector<16x16x4xbf16> to vector<256x4xbf16>
    %c2_40 = arith.constant 2 : index
    %c2_41 = arith.constant 2 : index
    %c0_42 = arith.constant 0 : index
    %c0_43 = arith.constant 0 : index
    %51 = vector.load %arg2[%c2_40, %c2_41, %c0_42, %c0_43] : memref<3x3x4x128xbf16, #tpu.memory_space<vmem>>, vector<1x1x4x128xbf16>
    %52 = vector.shape_cast %51 : vector<1x1x4x128xbf16> to vector<4x128xbf16>
    %cst_44 = arith.constant dense<0.000000e+00> : vector<256x128xf32>
    %53 = tpu.matmul %50, %52, %cst_44 {dimension_numbers = #tpu.dot_dimension_numbers<[1], [0], [0], [1], [0, 0, 1, 1], [], []>} : vector<256x4xbf16>, vector<4x128xbf16>, vector<256x128xf32> -> vector<256x128xf32>
    %54 = arith.addf %48, %53 : vector<256x128xf32>
    %cst_45 = arith.constant dense<0.000000e+00> : vector<128xf32>
    %55 = vector.multi_reduction <add>, %54, %cst_45 [0] : vector<256x128xf32> to vector<128xf32>
    %56 = vector.shape_cast %55 : vector<128xf32> to vector<1x128xf32>
    %cst_46 = arith.constant 3.906250e-03 : f32
    %57 = vector.broadcast %cst_46 : f32 to vector<1x128xf32>
    %58 = arith.mulf %56, %57 : vector<1x128xf32>
    %59 = vector.broadcast %58 : vector<1x128xf32> to vector<256x128xf32>
    %60 = arith.subf %54, %59 : vector<256x128xf32>
    %c0_47 = arith.constant 0 : index
    %c0_48 = arith.constant 0 : index
    %c0_49 = arith.constant 0 : index
    %61 = vector.load %arg3[%c0_47, %c0_48, %c0_49] : memref<1x1x128xf32, #tpu.memory_space<vmem>>, vector<1x1x128xf32>
    %62 = vector.shape_cast %61 : vector<1x1x128xf32> to vector<1x128xf32>
    %63 = vector.shape_cast %58 : vector<1x128xf32> to vector<1x1x128xf32>
    tpu.vector_store %arg3[%c0_47, %c0_48, %c0_49], %63 {strides = array<i32>} : memref<1x1x128xf32, #tpu.memory_space<vmem>>, vector<1x1x128xf32>,
    %64 = arith.mulf %60, %60 : vector<256x128xf32>
    %cst_50 = arith.constant dense<0.000000e+00> : vector<128xf32>
    %65 = vector.multi_reduction <add>, %64, %cst_50 [0] : vector<256x128xf32> to vector<128xf32>
    %66 = vector.shape_cast %65 : vector<128xf32> to vector<1x128xf32>
    %c0_51 = arith.constant 0 : index
    %c0_52 = arith.constant 0 : index
    %c0_53 = arith.constant 0 : index
    %67 = vector.load %arg4[%c0_51, %c0_52, %c0_53] : memref<1x1x128xf32, #tpu.memory_space<vmem>>, vector<1x1x128xf32>
    %68 = vector.shape_cast %67 : vector<1x1x128xf32> to vector<1x128xf32>
    %69 = vector.shape_cast %66 : vector<1x128xf32> to vector<1x1x128xf32>
    tpu.vector_store %arg4[%c0_51, %c0_52, %c0_53], %69 {strides = array<i32>} : memref<1x1x128xf32, #tpu.memory_space<vmem>>, vector<1x1x128xf32>,
    return
  }
  func.func @transform_0(%arg0: i32) -> (i32, i32, i32, i32) {
    %c0_i32 = arith.constant 0 : i32
    %c0_i32_0 = arith.constant 0 : i32
    %c0_i32_1 = arith.constant 0 : i32
    %c0_i32_2 = arith.constant 0 : i32
    return %arg0, %c0_i32, %c0_i32_0, %c0_i32_1 : i32, i32, i32, i32
  }
  func.func @transform_1(%arg0: i32) -> (i32, i32, i32, i32) {
    %c0_i32 = arith.constant 0 : i32
    %c0_i32_0 = arith.constant 0 : i32
    %c0_i32_1 = arith.constant 0 : i32
    %c0_i32_2 = arith.constant 0 : i32
    %c0_i32_3 = arith.constant 0 : i32
    return %c0_i32, %c0_i32_0, %c0_i32_1, %c0_i32_2 : i32, i32, i32, i32
  }
  func.func @transform_2(%arg0: i32) -> (i32, i32, i32) {
    %c0_i32 = arith.constant 0 : i32
    %c0_i32_0 = arith.constant 0 : i32
    %c0_i32_1 = arith.constant 0 : i32
    return %arg0, %c0_i32, %c0_i32_0 : i32, i32, i32
  }
  func.func @transform_3(%arg0: i32) -> (i32, i32, i32) {
    %c0_i32 = arith.constant 0 : i32
    %c0_i32_0 = arith.constant 0 : i32
    %c0_i32_1 = arith.constant 0 : i32
    return %arg0, %c0_i32, %c0_i32_0 : i32, i32, i32
  }
}

</mosaic_0001>

<bundles_post_ra>
// kernel: tpu_custom_call.1
= control target key start
LH: loop header
LB: loop body
LE: loop exit
PB: predicated region body
PF: predicated region fallthrough
CT: control target
= control target key end

     0   :  { %9 = vsyncpa [#allocation3], 0  ;;  %s4260_s0 = inlined_call_operand.vmem [shape: bf16[2,18,18,4], index: 0, kind: input, shape index: {}]   ;;  %s4261_s1 = inlined_call_operand.vmem [shape: bf16[3,3,4,128], index: 1, kind: input, shape index: {}]   ;;  %s4262_s2 = inlined_call_operand.hbm [shape: f32[2,1,128], index: 2, kind: output, shape index: {0}]   ;;  %s4263_s3 = inlined_call_operand.hbm [shape: f32[2,1,128], index: 3, kind: output, shape index: {1}]  }
   0x1   :  { %11 = vsyncpa [#allocation3 + $0x1], 0 }
   0x2   :  { %12 = vsyncpa [#allocation5], 0 }
   0x3   :  { %14 = vsyncpa [#allocation5 + $0x1], 0  ;;  %s2939_s12 = smov 0   ;;  %s2941_s13 = smov 0  }
   0x4   :  { %s2943_s14 = smov 0   ;;  %s2945_s15 = smov 0  }
   0x5 LB: > { %s2960_s16 = sadd.s32 4294967295, %s2917_s15   ;;  %s2500_s17 = sadd.s32 4294967294, %s2917_s15   ;;  %s2917_s15 = sphi %s2945_s15, %s4410_s15   ;;  %s2913_s14 = sphi %s2943_s14, %s4409_s14   ;;  %s2909_s13 = sphi %s2941_s13, %s4408_s13   ;;  %s2905_s12 = sphi %s2939_s12, %s4407_s12  }
   0x6   : > { %s2964_s18 = sadd.s32 1, %s2917_s15   ;;  %s74_s19 = sadd.s32 1, %s2913_s14 }
   0x7   : > { %s71_s20 = ssub.s32 %s2917_s15, %s2964_s18  ;;  %p84_p0 = scmp.ne.s32.totalorder %s2913_s14, %s2909_s13 }
   0x8   : > { %p72_p1 = scmp.eq.s32.totalorder %s71_s20, 0  ;;  %p85_p2 = scmp.eq.s32.totalorder %s2960_s16, 1 }
   0x9   : > { %p90_p3 = scmp.ne.s32.totalorder %s2909_s13, %s2905_s12  ;;  %p91_p4 = scmp.eq.s32.totalorder %s2500_s17, 1 }
   0xa   : > { %s2975_s21 = scalar_select %p72_p1, %s2913_s14, %s74_s19  }
   0xb   : > { %p2977_p5 = por %p85_p2, %p84_p0  ;;  %p2981_p6 = por %p91_p4, %p90_p3 }
   0xc   : > { %p2503_p7 = scmp.ge.s32.totalorder %s2917_s15, 1  ;;  %p146_p8 = scmp.lt.s32.totalorder %s2917_s15, 3 }
   0xe   : > { %p147_p9 = pnand %p2503_p7, %p146_p8 }
  0x10   : > { %150 = sbr.rel (%p147_p9) target bundleno = 864 (0x360), region = 28 }
  0x15   : > { %v2505_v0 = vld [vmem:[%s4261_s1 + $0x2] sm:$0x3]  ;;  %vm720_vm0 = vcmask 1041408   ;;  %p173_p10 = scmp.lt.s32.totalorder %s2960_s16, 1  ;;  %v2618_v2 = vld [vmem:[%s4261_s1 + $0x4] sm:$0x3]  ;;  %s2400_s5 = scalar_lea.hbm %s4262_s2, %s2960_s16 }
  0x16   : > { %v722_v1 = vsel %vm720_vm0, %v2505_v0, 0  ;;  %v1263_v3 = vsel %vm720_vm0, %v2618_v2, 0  ;;  %v2635_v4 = vld [vmem:[%s4261_s1 + $0x6] sm:$0x3]  ;;  %v233_v5 = vld [vmem:[%s4261_s1] sm:$0x3] }
  0x17   : > { %2767 = vmatpush.bf16.msra.mxu1 %v722_v1  ;;  %2768 = vmatpush.bf16.msra.mxu2 %v722_v1  ;;  %s174_s28 = scalar_select %p173_p10, %s2960_s16, 1  ;;  %v2656_v6 = vld [vmem:[%s4261_s1 + $0x8] sm:$0x3]  ;;  %v1397_v7 = vsel %vm720_vm0, %v2635_v4, 0  ;;  %v942_v8 = vsel %vm720_vm0, %v233_v5, 0  ;;  %vm671_vm4 = vcmask 31744  }
  0x18   : > { %2769 = vmatpush.bf16.msra.mxu3 %v722_v1  ;;  %731 = vmatpush.bf16.msra.mxu0 %v722_v1  ;;  %v1553_v9 = vsel %vm720_vm0, %v2656_v6, 0  ;;  %vm234_vm1 = vsmask.f32 3328  ;;  %vm235_vm2 = vsmask.f32 7440  ;;  %vm1049_vm5 = vcmask 1042432  }
  0x19   : > { %s2770_s8 = smul.u32 216, %s174_s28  ;;  %vm3039_vm3 = vmor %vm234_vm1, %vm235_vm2  ;;  %vm1050_vm6 = vcmask 1046532   ;;  %s4122_s29 = sand.u32 1, %s2909_s13  }
  0x1a   : > { %vm3342_vm7 = vmor %vm1049_vm5, %vm1050_vm6  ;;  %s166_s6 = scalar_lea.vmem [#allocation2], %s4122_s29  ;;  %s2388_s9 = scalar_lea.sflag [#allocation3], %s4122_s29 }
  0x1b   : > { %1272 = vmatpush.bf16.msrb.mxu2 %v1263_v3  ;;  %951 = vmatpush.bf16.msrb.mxu1 %v942_v8  ;;  %s3012_s11 = scalar_lea.vmem %s4260_s0, %s2770_s8  ;;  %s2402_s7 = sshll.u32 %s166_s6, 4  ;;  %s2403_s7 = int_to_ptr.vmem [resolvable:$true] %s2402_s7 }
  0x1c   : > { %1406 = vmatpush.bf16.msrb.mxu3 %v1397_v7  ;;  %1562 = vmatpush.bf16.msrb.mxu0 %v1553_v9  ;;  %v3015_v10 = vld [vmem:[%s3012_s11 + $0x30] sm:$0xf]  ;;  %v3018_v11 = vld [vmem:[%s3012_s11 + $0x34] sm:$0xf]  ;;  %v3021_v12 = vld [vmem:[%s3012_s11 + $0x38] sm:$0x1] }
  0x1d   : > { %v334_v13 = vshrl.u32 %v3015_v10, 16  ;;  %v337_v14 = vshll.u32 %v3015_v10, 16  ;;  %v343_v15 = vshll.u32 %v3018_v11, 16  ;;  %v347_v16 = vshrl.u32 %v3018_v11, 16  ;;  %v203_v17 = vld [vmem:[%s3012_s11 + $0x60] sm:$0xf] }
  0x1e   : > { %v353_v18 = vshll.u32 %v3021_v12, 16  ;;  %v3030_v19 = vld [vmem:[%s3012_s11 + $0x64] sm:$0xf]  ;;  %v205_v20 = vld [vmem:[%s3012_s11 + $0x68] sm:$0x1]  ;;  %v430_v21 = vshrl.u32 %v203_v17, 16 }
  0x1f   : > { %v336_v22 = vrot.slane %v334_v13, 4  ;;  %v339_v23 = vrot.slane %v337_v14, 5  ;;  %v345_v24 = vrot.slane %v343_v15, 5  ;;  %v349_v25 = vrot.slane %v347_v16, 4  ;;  %v215_v26 = vld [vmem:[%s3012_s11 + $0x90] sm:$0xf] }
  0x20   : > { %v355_v27 = vrot.slane %v353_v18, 5  ;;  %v432_v28 = vrot.slane %v430_v21, 4  ;;  %v433_v29 = vshll.u32 %v203_v17, 16  ;;  %v439_v30 = vshll.u32 %v3030_v19, 16  ;;  %v216_v35 = vld [vmem:[%s3012_s11 + $0x94] sm:$0xf] }
  0x21   : > { %v340_v31 = vor.u32 %v339_v23, %v336_v22  ;;  %v350_v32 = vor.u32 %v349_v25, %v345_v24  ;;  %v443_v33 = vshrl.u32 %v3030_v19, 16  ;;  %v449_v34 = vshll.u32 %v205_v20, 16  ;;  %v217_v45 = vld [vmem:[%s3012_s11 + $0x98] sm:$0x1]  ;;  %v3049_v61 = vld [vmem:[%s3012_s11] sm:$0xf] }
  0x22   : > { %v435_v37 = vrot.slane %v433_v29, 5  ;;  %v441_v38 = vrot.slane %v439_v30, 5  ;;  %v526_v39 = vshrl.u32 %v215_v26, 16  ;;  %v529_v47 = vshll.u32 %v215_v26, 16  ;;  %v3056_v1 = vld [vmem:[%s3012_s11 + $0x4] sm:$0xf] }
  0x23   : > { %v341_v40 = vrot.slane %v340_v31, 4  ;;  %v351_v41 = vrot.slane %v350_v32, 4  ;;  %v445_v42 = vrot.slane %v443_v33, 4  ;;  %v451_v43 = vrot.slane %v449_v34, 5  ;;  %v3059_v2 = vld [vmem:[%s3012_s11 + $0x8] sm:$0x1] }
  0x24   : > { %v436_v44 = vor.u32 %v435_v37, %v432_v28  ;;  %v528_v46 = vrot.slane %v526_v39, 4  ;;  %v535_v48 = vshll.u32 %v216_v35, 16  ;;  %v539_v52 = vshrl.u32 %v216_v35, 16  ;;  %v3075_v23 = vld [vmem:[%s3012_s11 + $0x3c] sm:$0xf]  ;;  %s2404_s8 = sshll.u32 %s2400_s5, 4  ;;  %s2405_s8 = int_to_ptr.hbm [resolvable:$true] %s2404_s8 }
  0x25   : > { %v346_v49 = vsel %vm3039_vm3, %v341_v40, %v345_v24  ;;  %v356_v50 = vsel %vm3039_vm3, %v351_v41, %v355_v27  ;;  %v446_v51 = vor.u32 %v445_v42, %v441_v38  ;;  %v531_v56 = vrot.slane %v529_v47, 5  ;;  %v3078_v24 = vld [vmem:[%s3012_s11 + $0x40] sm:$0xf]  ;;  %v3083_v29 = vld [vmem:[%s3012_s11 + $0x44] sm:$0x1]  ;;  %s2837_s10 = sshra.s32 %s2405_s8, 4  ;;  %s2838_s10 = int_to_ptr.hbm [resolvable:$true] %s2837_s10 }
  0x26   : > { %v631_v53 = vunpack.c.l.b16 %v346_v49  ;;  %v632_v54 = vunpack.c.l.b16 %v356_v50  ;;  %v437_v55 = vrot.slane %v436_v44, 4  ;;  %v537_v58 = vrot.slane %v535_v48, 5  ;;  %v3098_v47 = vld [vmem:[%s3012_s11 + $0x70] sm:$0xf]  ;;  %s2843_s20 = scalar_lea.hbm %s4262_s2, 2  ;;  %p2844_p0 = scmp.lt.s32.totalorder %s2838_s10, %s4262_s2 }
  0x27   : > { %v447_v57 = vrot.slane %v446_v51, 4  ;;  %v541_v59 = vrot.slane %v539_v52, 4  ;;  %v545_v60 = vshll.u32 %v217_v45, 16  ;;  %v532_v0 = vor.u32 %v531_v56, %v528_v46  ;;  %v3105_v51 = vld [vmem:[%s3012_s11 + $0x74] sm:$0x1] }
  0x28   : > { %v3051_v62 = vpack.c.b16 %v632_v54, %v631_v53  ;;  %v442_v63 = vsel %vm3039_vm3, %v437_v55, %v441_v38  ;;  %v238_v9 = vshrl.u32 %v3049_v61, 16  ;;  %v241_v13 = vshll.u32 %v3049_v61, 16  ;;  %v3091_v38 = vld [vmem:[%s3012_s11 + $0x6c] sm:$0xf] }
  0x29   : > { %v452_v3 = vsel %vm3039_vm3, %v447_v57, %v451_v43  ;;  %v639_v4 = vunpack.c.l.b16 %v442_v63  ;;  %v542_v5 = vor.u32 %v541_v59, %v537_v58  ;;  %v547_v6 = vrot.slane %v545_v60, 5 }
  0x2a   : > { %2510 = vmatmul.msk.bf16.vlgmr.msra.gmra.mxu1 %vm671_vm4, %v3051_v62  ;;  %v640_v7 = vunpack.c.l.b16 %v452_v3  ;;  %v533_v8 = vrot.slane %v532_v0, 4  ;;  %v247_v15 = vshll.u32 %v3056_v1, 16  ;;  %v251_v16 = vshrl.u32 %v3056_v1, 16 }
  0x2b   : > { %v543_v14 = vrot.slane %v542_v5, 4  ;;  %v257_v17 = vshll.u32 %v3059_v2, 16  ;;  %v240_v21 = vrot.slane %v238_v9, 4  ;;  %v243_v22 = vrot.slane %v241_v13, 5  ;;  %v218_v5 = vld [vmem:[%s3012_s11 + $0x9c] sm:$0xf] }
  0x2c   : > { %v3070_v18 = vpack.c.b16 %v640_v7, %v639_v4  ;;  %v538_v20 = vsel %vm3039_vm3, %v533_v8, %v537_v58  ;;  %v249_v27 = vrot.slane %v247_v15, 5  ;;  %v253_v28 = vrot.slane %v251_v16, 4  ;;  %v219_v9 = vld [vmem:[%s3012_s11 + $0xa0] sm:$0xf] }
  0x2d   : > { %v548_v25 = vsel %vm3039_vm3, %v543_v14, %v547_v6  ;;  %v647_v26 = vunpack.c.l.b16 %v538_v20  ;;  %v244_v31 = vor.u32 %v243_v22, %v240_v21  ;;  %v259_v32 = vrot.slane %v257_v17, 5  ;;  %v220_v17 = vld [vmem:[%s3012_s11 + $0xa4] sm:$0x1] }
  0x2e   : > { %4309 = vst [vmem:[#allocation8_spill] sm:$0xff] %v3070_v18  ;;  %2514 = vmatmul.msk.bf16.vlgmr.msra.gmra.mxu2 %vm671_vm4, %v3070_v18  ;;  %v648_v30 = vunpack.c.l.b16 %v548_v25  ;;  %v254_v33 = vor.u32 %v253_v28, %v249_v27  ;;  %v358_v34 = vshrl.u32 %v3075_v23, 16  ;;  %v361_v35 = vshll.u32 %v3075_v23, 16 }
  0x2f   : > { %v367_v37 = vshll.u32 %v3078_v24, 16  ;;  %v245_v40 = vrot.slane %v244_v31, 4  ;;  %v371_v41 = vshrl.u32 %v3078_v24, 16  ;;  %v377_v42 = vshll.u32 %v3083_v29, 16 }
  0x30   : > { %v3093_v39 = vpack.c.b16 %v648_v30, %v647_v26  ;;  %v255_v43 = vrot.slane %v254_v33, 4  ;;  %v360_v44 = vrot.slane %v358_v34, 4  ;;  %v363_v45 = vrot.slane %v361_v35, 5  ;;  %v3123_v35 = vld [vmem:[%s3012_s11 + $0xc] sm:$0xf] }
  0x31   : > { %v369_v46 = vrot.slane %v367_v37, 5  ;;  %v250_v48 = vsel %vm3039_vm3, %v245_v40, %v249_v27  ;;  %v373_v49 = vrot.slane %v371_v41, 4  ;;  %v379_v50 = vrot.slane %v377_v42, 5 }
  0x32   : > { %4310 = vst [vmem:[#allocation9_spill] sm:$0xff] %v3093_v39  ;;  %2518 = vmatmul.msk.bf16.vlgmr.msra.gmra.mxu3 %vm671_vm4, %v3093_v39  ;;  %v454_v52 = vshrl.u32 %v3091_v38, 16  ;;  %v260_v53 = vsel %vm3039_vm3, %v255_v43, %v259_v32  ;;  %v623_v54 = vunpack.c.l.b16 %v250_v48  ;;  %v364_v55 = vor.u32 %v363_v45, %v360_v44  ;;  %v3130_v43 = vld [vmem:[%s3012_s11 + $0x10] sm:$0xf]  ;;  %v3133_v48 = vld [vmem:[%s3012_s11 + $0x14] sm:$0x1] }
  0x33   : > { %v457_v56 = vshll.u32 %v3091_v38, 16  ;;  %v624_v57 = vunpack.c.l.b16 %v260_v53  ;;  %v374_v58 = vor.u32 %v373_v49, %v369_v46  ;;  %v463_v60 = vshll.u32 %v3098_v47, 16  ;;  %v3310_v39 = vld [vmem:[%s3012_s11 + $0x2c] sm:$0x1] }
  0x34   : > { %v456_v59 = vrot.slane %v454_v52, 4  ;;  %v365_v63 = vrot.slane %v364_v55, 4  ;;  %v467_v3 = vshrl.u32 %v3098_v47, 16  ;;  %v473_v4 = vshll.u32 %v3105_v51, 16 }
  0x35   : > { %v459_v0 = vrot.slane %v457_v56, 5  ;;  %v655_v6 = vpack.c.b16 %v624_v57, %v623_v54  ;;  %v375_v7 = vrot.slane %v374_v58, 4  ;;  %v465_v8 = vrot.slane %v463_v60, 5  ;;  %v3143_v58 = vld [vmem:[%s3012_s11 + $0x48] sm:$0xf] }
  0x36   : > { %v370_v13 = vsel %vm3039_vm3, %v365_v63, %v369_v46  ;;  %v469_v15 = vrot.slane %v467_v3, 4  ;;  %v475_v16 = vrot.slane %v473_v4, 5  ;;  %v550_v22 = vshrl.u32 %v218_v5, 16  ;;  %v3148_v3 = vld [vmem:[%s3012_s11 + $0x4c] sm:$0xf] }
  0x37   : > { %v460_v14 = vor.u32 %v459_v0, %v456_v59  ;;  %2506 = vmatmul.msk.bf16.vlgmr.msra.gmra.mxu0 %vm671_vm4, %v655_v6  ;;  %v380_v20 = vsel %vm3039_vm3, %v375_v7, %v379_v50  ;;  %v633_v21 = vunpack.c.l.b16 %v370_v13  ;;  %v553_v25 = vshll.u32 %v218_v5, 16 }
  0x38   : > { %v634_v26 = vunpack.c.l.b16 %v380_v20  ;;  %v470_v28 = vor.u32 %v469_v15, %v465_v8  ;;  %v559_v30 = vshll.u32 %v219_v9, 16  ;;  %v552_v31 = vrot.slane %v550_v22, 4  ;;  %v3155_v15 = vld [vmem:[%s3012_s11 + $0x50] sm:$0x1] }
  0x39   : > { %v461_v27 = vrot.slane %v460_v14, 4  ;;  %v555_v32 = vrot.slane %v553_v25, 5  ;;  %v563_v33 = vshrl.u32 %v219_v9, 16  ;;  %v569_v34 = vshll.u32 %v220_v17, 16 }
  0x3a   : > { %v3125_v37 = vpack.c.b16 %v634_v26, %v633_v21  ;;  %v471_v41 = vrot.slane %v470_v28, 4  ;;  %v561_v42 = vrot.slane %v559_v30, 5  ;;  %v262_v52 = vshrl.u32 %v3123_v35, 16  ;;  %v3166_v28 = vld [vmem:[%s3012_s11 + $0x78] sm:$0xf] }
  0x3b   : > { %v466_v40 = vsel %vm3039_vm3, %v461_v27, %v465_v8  ;;  %v556_v45 = vor.u32 %v555_v32, %v552_v31  ;;  %v565_v46 = vrot.slane %v563_v33, 4  ;;  %v571_v50 = vrot.slane %v569_v34, 5  ;;  %v3170_v34 = vld [vmem:[%s3012_s11 + $0x7c] sm:$0xf] }
  0x3c   : > { %v641_v44 = vunpack.c.l.b16 %v466_v40  ;;  %2511 = vmatmul.msk.bf16.gmra.mxu1 %vm671_vm4, %v3125_v37  ;;  %v476_v49 = vsel %vm3039_vm3, %v471_v41, %v475_v16  ;;  %v265_v53 = vshll.u32 %v3123_v35, 16  ;;  %v271_v57 = vshll.u32 %v3130_v43, 16 }
  0x3d   : > { %v642_v54 = vunpack.c.l.b16 %v476_v49  ;;  %v557_v55 = vrot.slane %v556_v45, 4  ;;  %v566_v56 = vor.u32 %v565_v46, %v561_v42  ;;  %v264_v59 = vrot.slane %v262_v52, 4 }
  0x3e   : > { %v267_v60 = vrot.slane %v265_v53, 5  ;;  %v275_v63 = vshrl.u32 %v3130_v43, 16  ;;  %v281_v0 = vshll.u32 %v3133_v48, 16  ;;  %v273_v7 = vrot.slane %v271_v57, 5 }
  0x3f   : > { %v3150_v4 = vpack.c.b16 %v642_v54, %v641_v44  ;;  %v562_v5 = vsel %vm3039_vm3, %v557_v55, %v561_v42  ;;  %v567_v6 = vrot.slane %v566_v56, 4  ;;  %v382_v17 = vshrl.u32 %v3143_v58, 16 }
  0x40   : > { %v649_v8 = vunpack.c.l.b16 %v562_v5  ;;  %v268_v9 = vor.u32 %v267_v60, %v264_v59  ;;  %v277_v13 = vrot.slane %v275_v63, 4  ;;  %v283_v14 = vrot.slane %v281_v0, 5 }
  0x41   : > { %2515 = vmatmul.msk.bf16.gmra.mxu2 %vm671_vm4, %v3150_v4  ;;  %v572_v16 = vsel %vm3039_vm3, %v567_v6, %v571_v50  ;;  %v385_v20 = vshll.u32 %v3143_v58, 16  ;;  %v391_v21 = vshll.u32 %v3148_v3, 16  ;;  %v395_v27 = vshrl.u32 %v3148_v3, 16  ;;  %v3177_v50 = vld [vmem:[%s3012_s11 + $0x80] sm:$0x1] }
  0x42   : > { %v650_v22 = vunpack.c.l.b16 %v572_v16  ;;  %v269_v25 = vrot.slane %v268_v9, 4  ;;  %v278_v26 = vor.u32 %v277_v13, %v273_v7  ;;  %v384_v30 = vrot.slane %v382_v17, 4  ;;  %v3196_v16 = vld [vmem:[%s3012_s11 + $0xac] sm:$0xf]  ;;  %v3199_v17 = vld [vmem:[%s3012_s11 + $0xb0] sm:$0x1] }
  0x43   : > { %v387_v31 = vrot.slane %v385_v20, 5  ;;  %v393_v32 = vrot.slane %v391_v21, 5  ;;  %v401_v33 = vshll.u32 %v3155_v15, 16  ;;  %v397_v44 = vrot.slane %v395_v27, 4  ;;  %4313 = vst [vmem:[#allocation12_spill] sm:$0xff] %v3196_v16 }
  0x44   : > { %v3172_v40 = vpack.c.b16 %v650_v22, %v649_v8  ;;  %v274_v41 = vsel %vm3039_vm3, %v269_v25, %v273_v7  ;;  %v279_v42 = vrot.slane %v278_v26, 4  ;;  %v478_v52 = vshrl.u32 %v3166_v28, 16  ;;  %v3189_v8 = vld [vmem:[%s3012_s11 + $0xa8] sm:$0xf]  ;;  %4314 = vst [vmem:[#allocation13_spill] sm:$0xff] %v3199_v17 }
  0x45   : > { %v625_v45 = vunpack.c.l.b16 %v274_v41  ;;  %v388_v46 = vor.u32 %v387_v31, %v384_v30  ;;  %v403_v49 = vrot.slane %v401_v33, 5  ;;  %v398_v54 = vor.u32 %v397_v44, %v393_v32  ;;  %4312 = vst [vmem:[#allocation11_spill] sm:$0xff] %v3189_v8 }
  0x46   : > { %4311 = vst [vmem:[#allocation10_spill] sm:$0xff] %v3172_v40  ;;  %2519 = vmatmul.msk.bf16.gmra.mxu3 %vm671_vm4, %v3172_v40  ;;  %v284_v53 = vsel %vm3039_vm3, %v279_v42, %v283_v14  ;;  %v481_v55 = vshll.u32 %v3166_v28, 16  ;;  %v487_v56 = vshll.u32 %v3170_v34, 16  ;;  %v480_v60 = vrot.slane %v478_v52, 4  ;;  %v3213_v52 = vld [vmem:[%s3012_s11 + $0x18] sm:$0xf] }
  0x47   : > { %v626_v57 = vunpack.c.l.b16 %v284_v53  ;;  %v389_v59 = vrot.slane %v388_v46, 4  ;;  %v491_v63 = vshrl.u32 %v3170_v34, 16  ;;  %v399_v0 = vrot.slane %v398_v54, 4  ;;  %v3299_v40 = vld [vmem:[%s3012_s11 + $0x24] sm:$0xf] }
  0x48   : > { %v483_v5 = vrot.slane %v481_v55, 5  ;;  %v489_v6 = vrot.slane %v487_v56, 5  ;;  %v497_v7 = vshll.u32 %v3177_v50, 16  ;;  %v574_v30 = vshrl.u32 %v3189_v8, 16  ;;  %v3218_v56 = vld [vmem:[%s3012_s11 + $0x1c] sm:$0xf] }
  0x49   : > { %v3191_v9 = vpack.c.b16 %v626_v57, %v625_v45  ;;  %v394_v13 = vsel %vm3039_vm3, %v389_v59, %v393_v32  ;;  %v493_v14 = vrot.slane %v491_v63, 4  ;;  %v404_v20 = vsel %vm3039_vm3, %v399_v0, %v403_v49  ;;  %v3221_v57 = vld [vmem:[%s3012_s11 + $0x20] sm:$0x1] }
  0x4a   : > { %v635_v21 = vunpack.c.l.b16 %v394_v13  ;;  %v484_v22 = vor.u32 %v483_v5, %v480_v60  ;;  %v499_v25 = vrot.slane %v497_v7, 5  ;;  %v636_v26 = vunpack.c.l.b16 %v404_v20 }
  0x4b   : > { %2507 = vmatmul.msk.bf16.gmra.mxu0 %vm671_vm4, %v3191_v9  ;;  %v494_v27 = vor.u32 %v493_v14, %v489_v6  ;;  %v577_v31 = vshll.u32 %v3189_v8, 16  ;;  %v583_v33 = vshll.u32 %v3196_v16, 16  ;;  %v587_v41 = vshrl.u32 %v3196_v16, 16 }
  0x4c   : > { %v485_v32 = vrot.slane %v484_v22, 4  ;;  %v593_v42 = vshll.u32 %v3199_v17, 16  ;;  %v3210_v44 = vpack.c.b16 %v636_v26, %v635_v21  ;;  %v576_v46 = vrot.slane %v574_v30, 4  ;;  %v3233_v26 = vld [vmem:[%s3012_s11 + $0x54] sm:$0xf] }
  0x4d   : > { %v495_v45 = vrot.slane %v494_v27, 4  ;;  %v579_v49 = vrot.slane %v577_v31, 5  ;;  %v585_v54 = vrot.slane %v583_v33, 5  ;;  %v589_v55 = vrot.slane %v587_v41, 4  ;;  %v3277_v17 = vld [vmem:[%s3012_s11 + $0xb4] sm:$0xf] }
  0x4e   : > { %4315 = vst [vmem:[#allocation14_spill] sm:$0xff] %v3210_v44  ;;  %v490_v53 = vsel %vm3039_vm3, %v485_v32, %v489_v6  ;;  %2512 = vmatmul.msk.bf16.gmra.mxu1 %vm671_vm4, %v3210_v44  ;;  %v595_v0 = vrot.slane %v593_v42, 5  ;;  %v286_v6 = vshrl.u32 %v3213_v52, 16  ;;  %v289_v13 = vshll.u32 %v3213_v52, 16  ;;  %v3238_v32 = vld [vmem:[%s3012_s11 + $0x58] sm:$0xf] }
  0x4f   : > { %v500_v59 = vsel %vm3039_vm3, %v495_v45, %v499_v25  ;;  %v643_v60 = vunpack.c.l.b16 %v490_v53  ;;  %v580_v63 = vor.u32 %v579_v49, %v576_v46  ;;  %v590_v7 = vor.u32 %v589_v55, %v585_v54  ;;  %v3243_v46 = vld [vmem:[%s3012_s11 + $0x5c] sm:$0x1]  ;;  %4318 = vst [vmem:[#allocation17_spill] sm:$0xff] %v3277_v17 }
  0x50   : > { %v644_v5 = vunpack.c.l.b16 %v500_v59  ;;  %v295_v20 = vshll.u32 %v3218_v56, 16  ;;  %v299_v21 = vshrl.u32 %v3218_v56, 16  ;;  %v305_v22 = vshll.u32 %v3221_v57, 16 }
  0x51   : > { %v581_v14 = vrot.slane %v580_v63, 4  ;;  %v591_v27 = vrot.slane %v590_v7, 4  ;;  %v288_v30 = vrot.slane %v286_v6, 4  ;;  %v291_v31 = vrot.slane %v289_v13, 5  ;;  %v3253_v7 = vld [vmem:[%s3012_s11 + $0x84] sm:$0xf] }
  0x52   : > { %v3235_v25 = vpack.c.b16 %v644_v5, %v643_v60  ;;  %v297_v41 = vrot.slane %v295_v20, 5  ;;  %v301_v42 = vrot.slane %v299_v21, 4  ;;  %v307_v45 = vrot.slane %v305_v22, 5  ;;  %4316 = vst [vmem:[#allocation15_spill] sm:$0xff] %v3253_v7 }
  0x53   : > { %v586_v33 = vsel %vm3039_vm3, %v581_v14, %v585_v54  ;;  %v596_v49 = vsel %vm3039_vm3, %v591_v27, %v595_v0  ;;  %v292_v55 = vor.u32 %v291_v31, %v288_v30  ;;  %v406_v59 = vshrl.u32 %v3233_v26, 16  ;;  %v3260_v30 = vld [vmem:[%s3012_s11 + $0x88] sm:$0xf] }
  0x54   : > { %2516 = vmatmul.msk.bf16.gmra.mxu2 %vm671_vm4, %v3235_v25  ;;  %v651_v53 = vunpack.c.l.b16 %v586_v33  ;;  %v652_v60 = vunpack.c.l.b16 %v596_v49  ;;  %v302_v63 = vor.u32 %v301_v42, %v297_v41  ;;  %v409_v54 = vshll.u32 %v3233_v26, 16  ;;  %v3265_v49 = vld [vmem:[%s3012_s11 + $0x8c] sm:$0x1] }
  0x55   : > { %v415_v5 = vshll.u32 %v3238_v32, 16  ;;  %v293_v6 = vrot.slane %v292_v55, 4  ;;  %v408_v13 = vrot.slane %v406_v59, 4  ;;  %v419_v14 = vshrl.u32 %v3238_v32, 16 }
  0x56   : > { %v425_v0 = vshll.u32 %v3243_v46, 16  ;;  %v3257_v20 = vpack.c.b16 %v652_v60, %v651_v53  ;;  %v303_v21 = vrot.slane %v302_v63, 4  ;;  %v411_v22 = vrot.slane %v409_v54, 5 }
  0x57   : > { %v417_v27 = vrot.slane %v415_v5, 5  ;;  %v298_v31 = vsel %vm3039_vm3, %v293_v6, %v297_v41  ;;  %v421_v33 = vrot.slane %v419_v14, 4  ;;  %v502_v55 = vshrl.u32 %v3253_v7, 16 }
  0x58   : > { %4317 = vst [vmem:[#allocation16_spill] sm:$0xff] %v3257_v20  ;;  %v427_v42 = vrot.slane %v425_v0, 5  ;;  %2520 = vmatmul.msk.bf16.gmra.mxu3 %vm671_vm4, %v3257_v20  ;;  %v308_v53 = vsel %vm3039_vm3, %v303_v21, %v307_v45  ;;  %v627_v59 = vunpack.c.l.b16 %v298_v31  ;;  %v412_v60 = vor.u32 %v411_v22, %v408_v13  ;;  %v3282_v22 = vld [vmem:[%s3012_s11 + $0xb8] sm:$0xf] }
  0x59   : > { %v505_v63 = vshll.u32 %v3253_v7, 16  ;;  %v628_v54 = vunpack.c.l.b16 %v308_v53  ;;  %v422_v41 = vor.u32 %v421_v33, %v417_v27  ;;  %v504_v5 = vrot.slane %v502_v55, 4  ;;  %4319 = vst [vmem:[#allocation18_spill] sm:$0xff] %v3282_v22 }
  0x5a   : > { %v511_v6 = vshll.u32 %v3260_v30, 16  ;;  %v413_v14 = vrot.slane %v412_v60, 4  ;;  %v515_v8 = vshrl.u32 %v3260_v30, 16  ;;  %v521_v20 = vshll.u32 %v3265_v49, 16  ;;  %v3287_v60 = vld [vmem:[%s3012_s11 + $0xbc] sm:$0x1] }
  0x5b   : > { %v507_v0 = vrot.slane %v505_v63, 5  ;;  %v3279_v45 = vpack.c.b16 %v628_v54, %v627_v59  ;;  %v423_v21 = vrot.slane %v422_v41, 4  ;;  %4320 = vst [vmem:[#allocation19_spill] sm:$0xff] %v3287_v60  ;;  %v598_v54 = vshrl.u32 %v3277_v17, 16 }
  0x5c   : > { %v513_v13 = vrot.slane %v511_v6, 5  ;;  %v418_v31 = vsel %vm3039_vm3, %v413_v14, %v417_v27  ;;  %v517_v55 = vrot.slane %v515_v8, 4  ;;  %v523_v53 = vrot.slane %v521_v20, 5 }
  0x5d   : > { %v508_v33 = vor.u32 %v507_v0, %v504_v5  ;;  %2508 = vmatmul.msk.bf16.gmra.mxu0 %vm671_vm4, %v3279_v45  ;;  %v428_v59 = vsel %vm3039_vm3, %v423_v21, %v427_v42  ;;  %v637_v63 = vunpack.c.l.b16 %v418_v31  ;;  %v601_v41 = vshll.u32 %v3277_v17, 16 }
  0x5e   : > { %v638_v6 = vunpack.c.l.b16 %v428_v59  ;;  %v518_v5 = vor.u32 %v517_v55, %v513_v13  ;;  %v607_v8 = vshll.u32 %v3282_v22, 16  ;;  %v600_v20 = vrot.slane %v598_v54, 4 }
  0x5f   : > { %v509_v27 = vrot.slane %v508_v33, 4  ;;  %v603_v14 = vrot.slane %v601_v41, 5  ;;  %v611_v0 = vshrl.u32 %v3282_v22, 16  ;;  %v617_v16 = vshll.u32 %v3287_v60, 16  ;;  %v3306_v33 = vld [vmem:[%s3012_s11 + $0x28] sm:$0xf] }
  0x60   : > { %v3301_v42 = vpack.c.b16 %v638_v6, %v637_v63  ;;  %v519_v31 = vrot.slane %v518_v5, 4  ;;  %v609_v59 = vrot.slane %v607_v8, 5  ;;  %v1057_v55 = vrot.slane %v3059_v2, 5 }
  0x61   : > { %v514_v21 = vsel %vm3039_vm3, %v509_v27, %v513_v13  ;;  %v604_v54 = vor.u32 %v603_v14, %v600_v20  ;;  %v613_v41 = vrot.slane %v611_v0, 4  ;;  %v619_v6 = vrot.slane %v617_v16, 5 }
  0x62   : > { %4321 = vst [vmem:[#allocation20_spill] sm:$0xff] %v3301_v42  ;;  %v645_v17 = vunpack.c.l.b16 %v514_v21  ;;  %2513 = vmatmul.msk.bf16.gmra.mxu1 %vm671_vm4, %v3301_v42  ;;  %v524_v63 = vsel %vm3039_vm3, %v519_v31, %v523_v53  ;;  %v310_v13 = vshrl.u32 %v3299_v40, 16  ;;  %v313_v27 = vshll.u32 %v3299_v40, 16 }
  0x63   : > { %v646_v5 = vunpack.c.l.b16 %v524_v63  ;;  %v605_v8 = vrot.slane %v604_v54, 4  ;;  %v614_v60 = vor.u32 %v613_v41, %v609_v59  ;;  %v319_v2 = vshll.u32 %v3306_v33, 16  ;;  %v2691_v54 = vld [vmem:[%s4261_s1 + $0xc] sm:$0x3]  ;;  %v2712_v41 = vld [vmem:[%s4261_s1 + $0xe] sm:$0x3] }
  0x64   : > { %v312_v20 = vrot.slane %v310_v13, 4  ;;  %v315_v14 = vrot.slane %v313_v27, 5  ;;  %v323_v0 = vshrl.u32 %v3306_v33, 16  ;;  %v329_v21 = vshll.u32 %v3310_v39, 16 }
  0x65   : > { %v3321_v22 = vpack.c.b16 %v646_v5, %v645_v17  ;;  %v610_v16 = vsel %vm3039_vm3, %v605_v8, %v609_v59  ;;  %v615_v53 = vrot.slane %v614_v60, 4  ;;  %v321_v31 = vrot.slane %v319_v2, 5  ;;  %v2674_v17 = vld [vmem:[%s4261_s1 + $0xa] sm:$0x3]  ;;  %v2730_v60 = vld [vmem:[%s4261_s1 + $0x10] sm:$0x3] }
  0x66   : > { %v653_v63 = vunpack.c.l.b16 %v610_v16  ;;  %v316_v13 = vor.u32 %v315_v14, %v312_v20  ;;  %v325_v27 = vrot.slane %v323_v0, 4  ;;  %v331_v7 = vrot.slane %v329_v21, 5 }
  0x67   : > { %4322 = vst [vmem:[#allocation21_spill] sm:$0xff] %v3321_v22  ;;  %2517 = vmatmul.msk.bf16.gmra.mxu2 %vm671_vm4, %v3321_v22  ;;  %v620_v59 = vsel %vm3039_vm3, %v615_v53, %v619_v6  ;;  %v2602_v5 = vrot.slane %v3049_v61, 9  ;;  %v1054_v0 = vrot.slane %v3056_v1, 5  ;;  %v1827_v21 = vsel %vm720_vm0, %v2691_v54, 0 }
  0x68   : > { %v654_v8 = vunpack.c.l.b16 %v620_v59  ;;  %v317_v2 = vrot.slane %v316_v13, 4  ;;  %v326_v20 = vor.u32 %v325_v27, %v321_v31  ;;  %v1983_v16 = vsel %vm720_vm0, %v2712_v41, 0  ;;  %1836 = vmatpush.bf16.msra.mxu2 %v1827_v21  ;;  %v2750_v21 = vld [vmem:[%s3012_s11 + $0xc] sm:$0xff] }
  0x69   : > { %v1693_v22 = vsel %vm720_vm0, %v2674_v17, 0  ;;  %v2123_v6 = vsel %vm720_vm0, %v2730_v60, 0  ;;  %v1055_v27 = vsel %vm3342_vm7, %v2602_v5, %v1054_v0  ;;  %1992 = vmatpush.bf16.msra.mxu3 %v1983_v16  ;;  %v1056_v54 = vrot.slane %v1054_v0, 4 }
  0x6a   : > { %v3351_v53 = vpack.c.b16 %v654_v8, %v653_v63  ;;  %v322_v61 = vsel %vm3039_vm3, %v317_v2, %v321_v31  ;;  %v327_v13 = vrot.slane %v326_v20, 4  ;;  %1702 = vmatpush.bf16.msra.mxu1 %v1693_v22  ;;  %2132 = vmatpush.bf16.msra.mxu0 %v2123_v6  ;;  %v2603_v41 = vrot.slane %v3123_v35, 9  ;;  %v2749_v22 = vld [vmem:[%s3012_s11] sm:$0xff]  ;;  %v3388_v6 = vld [vmem:[%s3012_s11 + $0x18] sm:$0xff] }
  0x6b   : > { %v629_v1 = vunpack.c.l.b16 %v322_v61  ;;  %v1166_v31 = vunpack.c.l.b16 %v1055_v27  ;;  %v1061_v17 = vrot.slane %v3130_v43, 5  ;;  %v1064_v60 = vrot.slane %v3133_v48, 5 }
  0x6c   : > { %2521 = vmatmul.msk.bf16.gmra.mxu3 %vm671_vm4, %v3351_v53  ;;  %v332_v63 = vsel %vm3039_vm3, %v327_v13, %v331_v7  ;;  %v1058_v5 = vsel %vm3342_vm7, %v1056_v54, %v1057_v55  ;;  %v1068_v16 = vrot.slane %v3218_v56, 5  ;;  %v2604_v61 = vrot.slane %v3213_v52, 9 }
  0x6d   : > { %v630_v59 = vunpack.c.l.b16 %v332_v63  ;;  %v1167_v8 = vunpack.c.l.b16 %v1058_v5  ;;  %v1062_v35 = vsel %vm3342_vm7, %v2603_v41, %v1061_v17  ;;  %v1063_v2 = vrot.slane %v1061_v17, 4  ;;  %v3408_v41 = vld [vmem:[%s3012_s11 + $0x24] sm:$0xff] }
  0x6e   : > { %v1168_v7 = vunpack.c.l.b16 %v1062_v35  ;;  %v1070_v13 = vrot.slane %v1068_v16, 4  ;;  %v1071_v27 = vrot.slane %v3221_v57, 5  ;;  %v1075_v57 = vrot.slane %v3306_v33, 5 }
  0x6f   : > { %v3369_v20 = vpack.c.b16 %v630_v59, %v629_v1  ;;  %v1198_v0 = vpack.c.b16 %v1167_v8, %v1166_v31  ;;  %v1065_v43 = vsel %vm3342_vm7, %v1063_v2, %v1064_v60  ;;  %v2605_v63 = vrot.slane %v3299_v40, 9  ;;  %v3430_v8 = vld [vmem:[%s3012_s11 + $0x30] sm:$0xff] }
  0x70   : > { %v1169_v48 = vunpack.c.l.b16 %v1065_v43  ;;  %v1072_v56 = vsel %vm3342_vm7, %v1070_v13, %v1071_v27  ;;  %v1077_v31 = vrot.slane %v1075_v57, 4  ;;  %v1078_v17 = vrot.slane %v3310_v39, 5  ;;  %v3458_v27 = vld [vmem:[%s3012_s11 + $0x3c] sm:$0xff] }
  0x71   : > { %2509 = vmatmul.msk.bf16.gmra.mxu0 %vm671_vm4, %v3369_v20  ;;  %v1171_v54 = vunpack.c.l.b16 %v1072_v56  ;;  %v1076_v60 = vsel %vm3342_vm7, %v2605_v63, %v1075_v57  ;;  %v1082_v39 = vrot.slane %v3018_v11, 5  ;;  %v2606_v35 = vrot.slane %v3015_v10, 9 }
  0x72   : > { %2586 = vmatmul.msk.bf16.vlgmr.msrb.gmra.mxu1 %vm671_vm4, %v2749_v22  ;;  %v3376_v55 = vpack.c.b16 %v1169_v48, %v1168_v7  ;;  %v1079_v33 = vsel %vm3342_vm7, %v1077_v31, %v1078_v17  ;;  %v1172_v59 = vunpack.c.l.b16 %v1076_v60  ;;  %v1085_v7 = vrot.slane %v3021_v12, 5 }
  0x73   : > { %v1173_v5 = vunpack.c.l.b16 %v1079_v33  ;;  %v1084_v2 = vrot.slane %v1082_v39, 4  ;;  %v1089_v13 = vrot.slane %v3078_v24, 5  ;;  %v2607_v56 = vrot.slane %v3075_v23, 9 }
  0x75   : > { %v3422_v40 = vpack.c.b16 %v1173_v5, %v1172_v59  ;;  %v1086_v11 = vsel %vm3342_vm7, %v1084_v2, %v1085_v7  ;;  %v1090_v24 = vsel %vm3342_vm7, %v2607_v56, %v1089_v13  ;;  %v1096_v5 = vrot.slane %v3148_v3, 5 }
  0x76   : > { %v1176_v23 = vunpack.c.l.b16 %v1090_v24  ;;  %v2608_v7 = vrot.slane %v3143_v58, 9  ;;  %v1103_v24 = vrot.slane %v3238_v32, 5 }
  0x77   : > { %2619 = vmatmul.msk.bf16.vlgmr.msrb.gmra.mxu2 %vm671_vm4, %v1198_v0  ;;  %v1083_v0 = vsel %vm3342_vm7, %v2606_v35, %v1082_v39  ;;  %v3492_v35 = vld [vmem:[%s3012_s11 + $0x48] sm:$0xff] }
  0x78   : > { %v1174_v48 = vunpack.c.l.b16 %v1083_v0  ;;  %4327 = vst [vmem:[#allocation24_spill] sm:$0xff] %v3492_v35  ;;  %v1098_v0 = vrot.slane %v1096_v5, 4 }
  0x7c   : > { %2640 = vmatmul.msk.bf16.vlgmr.msrb.gmra.mxu3 %vm671_vm4, %v2750_v21 }
  0x81   : > { %2657 = vmatmul.msk.bf16.vlgmr.msrb.gmra.mxu0 %vm671_vm4, %v3191_v9  ;;  %v1069_v9 = vsel %vm3342_vm7, %v2604_v61, %v1068_v16 }
  0x82   : > { %2587 = vmatmul.msk.bf16.gmra.mxu1 %vm671_vm4, %v2750_v21  ;;  %v1170_v1 = vunpack.c.l.b16 %v1069_v9  ;;  %v1175_v21 = vunpack.c.l.b16 %v1086_v11  ;;  %v1099_v11 = vrot.slane %v3155_v15, 5 }
  0x84   : > { %v3402_v52 = vpack.c.b16 %v1171_v54, %v1170_v1  ;;  %v3450_v12 = vpack.c.b16 %v1175_v21, %v1174_v48  ;;  %v1091_v1 = vrot.slane %v1089_v13, 4  ;;  %v1092_v54 = vrot.slane %v3083_v29, 5 }
  0x85   : > { %v1097_v21 = vsel %vm3342_vm7, %v2608_v7, %v1096_v5  ;;  %v1100_v13 = vsel %vm3342_vm7, %v1098_v0, %v1099_v11  ;;  %v2609_v5 = vrot.slane %v3233_v26, 9  ;;  %v1105_v7 = vrot.slane %v1103_v24, 4 }
  0x86   : > { %v1093_v63 = vsel %vm3342_vm7, %v1091_v1, %v1092_v54  ;;  %v1178_v56 = vunpack.c.l.b16 %v1097_v21  ;;  %v1179_v1 = vunpack.c.l.b16 %v1100_v13  ;;  %v1106_v0 = vrot.slane %v3243_v46, 5 }
  0x87   : > { %2620 = vmatmul.msk.bf16.gmra.mxu2 %vm671_vm4, %v3376_v55  ;;  %v1177_v60 = vunpack.c.l.b16 %v1093_v63  ;;  %v1104_v32 = vsel %vm3342_vm7, %v2609_v5, %v1103_v24  ;;  %v1110_v5 = vrot.slane %v3030_v19, 5 }
  0x88   : > { %v3516_v54 = vpack.c.b16 %v1179_v1, %v1178_v56  ;;  %v1107_v13 = vsel %vm3342_vm7, %v1105_v7, %v1106_v0  ;;  %v1180_v56 = vunpack.c.l.b16 %v1104_v32  ;;  %v2815_v32 = vld [vmem:[%s3012_s11 + $0x68] sm:$0x1] }
  0x89   : > { %v3482_v33 = vpack.c.b16 %v1177_v60, %v1176_v23  ;;  %v3526_v60 = vld [vmem:[%s3012_s11 + $0x54] sm:$0xff]  ;;  %v1181_v46 = vunpack.c.l.b16 %v1107_v13  ;;  %v1113_v13 = vrot.slane %v2815_v32, 5 }
  0x8a   : > { %4330 = vst [vmem:[#allocation27_spill] sm:$0xff] %v3516_v54 }
  0x8b   : > { %4331 = vst [vmem:[#allocation28_spill] sm:$0xff] %v3526_v60 }
  0x8c   : > { %2641 = vmatmul.msk.bf16.gmra.mxu3 %vm671_vm4, %v3388_v6 }
  0x91   : > { %2658 = vmatmul.msk.bf16.gmra.mxu0 %vm671_vm4, %v3279_v45 }
  0x92   : > { %2588 = vmatmul.msk.bf16.gmra.mxu1 %vm671_vm4, %v3388_v6 }
  0x97   : > { %2621 = vmatmul.msk.bf16.gmra.mxu2 %vm671_vm4, %v3402_v52 }
  0x9c   : > { %2642 = vmatmul.msk.bf16.gmra.mxu3 %vm671_vm4, %v3408_v41 }
  0xa1   : > { %2659 = vmatmul.msk.bf16.gmra.mxu0 %vm671_vm4, %v3369_v20 }
  0xa2   : > { %2589 = vmatmul.msk.bf16.gmra.mxu1 %vm671_vm4, %v3408_v41 }
  0xa7   : > { %v3425_v22 = vpop.f32.mrf.mxu1  ;;  %2622 = vmatmul.msk.bf16.gmra.mxu2 %vm671_vm4, %v3422_v40 }
  0xac   : > { %2643 = vmatmul.msk.bf16.gmra.mxu3 %vm671_vm4, %v3430_v8 }
  0xaf   : > { %v3440_v43 = vpop.f32.mrf.mxu1 }
  0xb1   : > { %v3442_v16 = vpop.f32.mrf.mxu2  ;;  %2660 = vmatmul.msk.bf16.gmra.mxu0 %vm671_vm4, %v3051_v62 }
  0xb2   : > { %2590 = vmatmul.msk.bf16.gmra.mxu1 %vm671_vm4, %v3430_v8 }
  0xb4   : > { %v3448_v10 = vpop.f32.mrf.mxu0 }
  0xb5   : > { %v3452_v61 = vpop.f32.mrf.mxu3 }
  0xb6   : > { %4325 = vst [vmem:[#allocation22_spill] sm:$0xff] %v3452_v61 }
  0xb7   : > { %2623 = vmatmul.msk.bf16.gmra.mxu2 %vm671_vm4, %v3450_v12 }
  0xb9   : > { %v3460_v9 = vpop.f32.mrf.mxu1  ;;  %v3464_v57 = vpop.f32.mrf.mxu2 }
  0xbc   : > { %2644 = vmatmul.msk.bf16.gmra.mxu3 %vm671_vm4, %v3458_v27  ;;  %v3472_v31 = vpop.f32.mrf.mxu0 }
  0xbd   : > { %v3474_v17 = vpop.f32.mrf.mxu3 }
  0xbe   : > { %4326 = vst [vmem:[#allocation23_spill] sm:$0xff] %v3474_v17 }
  0xc1   : > { %2661 = vmatmul.msk.bf16.gmra.mxu0 %vm671_vm4, %v3125_v37  ;;  %v3478_v29 = vpop.f32.mrf.mxu1 }
  0xc2   : > { %2591 = vmatmul.msk.bf16.gmra.mxu1 %vm671_vm4, %v3458_v27 }
  0xc4   : > { %v3484_v59 = vpop.f32.mrf.mxu2 }
  0xc7   : > { %2624 = vmatmul.msk.bf16.gmra.mxu2 %vm671_vm4, %v3482_v33 }
  0xc8   : > { %v3487_v39 = vpop.f32.mrf.mxu0 }
  0xc9   : > { %v3494_v2 = vpop.f32.mrf.mxu3 }
  0xca   : > { %4328 = vst [vmem:[#allocation25_spill] sm:$0xff] %v3494_v2 }
  0xcb   : > { %v3498_v48 = vpop.f32.mrf.mxu1 }
  0xcc   : > { %2645 = vmatmul.msk.bf16.gmra.mxu3 %vm671_vm4, %v3492_v35  ;;  %v3502_v3 = vpop.f32.mrf.mxu2 }
  0xd0   : > { %v3508_v58 = vpop.f32.mrf.mxu0 }
  0xd1   : > { %2662 = vmatmul.msk.bf16.gmra.mxu0 %vm671_vm4, %v3210_v44  ;;  %v3512_v15 = vpop.f32.mrf.mxu3 }
  0xd2   : > { %4329 = vst [vmem:[#allocation26_spill] sm:$0xff] %v3512_v15  ;;  %2592 = vmatmul.msk.bf16.gmra.mxu1 %vm671_vm4, %v3492_v35  ;;  %v3561_v15 = vld [vmem:[%s3012_s11 + $0x60] sm:$0xff] }
  0xd3   : > { %v3519_v63 = vpop.f32.mrf.mxu1  ;;  %4335 = vst [vmem:[#allocation32_spill] sm:$0xff] %v3561_v15 }
  0xd7   : > { %v3521_v23 = vpop.f32.mrf.mxu2  ;;  %2625 = vmatmul.msk.bf16.gmra.mxu2 %vm671_vm4, %v3516_v54 }
  0xda   : > { %v3530_v11 = vpop.f32.mrf.mxu0 }
  0xdb   : > { %v3532_v21 = vpop.f32.mrf.mxu3 }
  0xdc   : > { %4332 = vst [vmem:[#allocation29_spill] sm:$0xff] %v3532_v21  ;;  %2646 = vmatmul.msk.bf16.gmra.mxu3 %vm671_vm4, %v3526_v60  ;;  %v3548_v21 = vpack.c.b16 %v1181_v46, %v1180_v56 }
  0xde   : > { %4333 = vst [vmem:[#allocation30_spill] sm:$0xff] %v3548_v21 }
  0xdf   : > { %v3540_v26 = vpop.f32.mrf.mxu1  ;;  %v3542_v1 = vpop.f32.mrf.mxu2 }
  0xe1   : > { %2663 = vmatmul.msk.bf16.gmra.mxu0 %vm671_vm4, %v3301_v42  ;;  %v2816_v42 = vld [vmem:[%s3012_s11 + $0x60] sm:$0xf] }
  0xe2   : > { %2593 = vmatmul.msk.bf16.gmra.mxu1 %vm671_vm4, %v3526_v60  ;;  %v3550_v24 = vpop.f32.mrf.mxu0  ;;  %v2610_v2 = vrot.slane %v2816_v42, 9  ;;  %v1112_v60 = vrot.slane %v1110_v5, 4 }
  0xe3   : > { %v3553_v7 = vpop.f32.mrf.mxu3 }
  0xe4   : > { %4334 = vst [vmem:[#allocation31_spill] sm:$0xff] %v3553_v7  ;;  %v1111_v19 = vsel %vm3342_vm7, %v2610_v2, %v1110_v5  ;;  %v1114_v46 = vsel %vm3342_vm7, %v1112_v60, %v1113_v13  ;;  %v1117_v60 = vrot.slane %v3098_v47, 5 }
  0xe5   : > { %v1182_v17 = vunpack.c.l.b16 %v1111_v19  ;;  %v1183_v42 = vunpack.c.l.b16 %v1114_v46  ;;  %v3594_v19 = vld [vmem:[%s3012_s11 + $0x6c] sm:$0xff] }
  0xe7   : > { %2626 = vmatmul.msk.bf16.gmra.mxu2 %vm671_vm4, %v3548_v21  ;;  %v3557_v0 = vpop.f32.mrf.mxu1  ;;  %v3583_v2 = vpack.c.b16 %v1183_v42, %v1182_v17  ;;  %v1119_v17 = vrot.slane %v1117_v60, 4 }
  0xe9   : > { %4337 = vst [vmem:[#allocation34_spill] sm:$0xff] %v3583_v2 }
  0xea   : > { %v3564_v56 = vpop.f32.mrf.mxu2 }
  0xec   : > { %2647 = vmatmul.msk.bf16.gmra.mxu3 %vm671_vm4, %v3561_v15 }
  0xee   : > { %v3572_v7 = vpop.f32.mrf.mxu0 }
  0xef   : > { %v3574_v32 = vpop.f32.mrf.mxu3  ;;  %v953_v21 = vpop.f32.mrf.mxu1 }
  0xf0   : > { %4336 = vst [vmem:[#allocation33_spill] sm:$0xff] %v3574_v32  ;;  %v954_v54 = vadd.f32 %v953_v21, %v3448_v10  ;;  %v1120_v21 = vrot.slane %v3105_v51, 5  ;;  %v2611_v32 = vrot.slane %v3091_v38, 9 }
  0xf1   : > { %2664 = vmatmul.msk.bf16.gmra.mxu0 %vm671_vm4, %v3070_v18 }
  0xf2   : > { %v3579_v44 = vpop.f32.mrf.mxu2  ;;  %2594 = vmatmul.msk.bf16.gmra.mxu1 %vm671_vm4, %v3561_v15  ;;  %v1118_v47 = vsel %vm3342_vm7, %v2611_v32, %v1117_v60 }
  0xf3   : > { %v1184_v61 = vunpack.c.l.b16 %v1118_v47 }
  0xf6   : > { %v3586_v5 = vpop.f32.mrf.mxu0 }
  0xf7   : > { %v3588_v13 = vpop.f32.mrf.mxu3  ;;  %2627 = vmatmul.msk.bf16.gmra.mxu2 %vm671_vm4, %v3583_v2  ;;  %v955_v10 = vpop.f32.mrf.mxu1 }
  0xf8   : > { %4338 = vst [vmem:[#allocation35_spill] sm:$0xff] %v3588_v13  ;;  %v956_v46 = vadd.f32 %v955_v10, %v3472_v31  ;;  %v1121_v13 = vsel %vm3342_vm7, %v1119_v17, %v1120_v21  ;;  %v1124_v21 = vrot.slane %v3170_v34, 5 }
  0xf9   : > { %v1185_v35 = vunpack.c.l.b16 %v1121_v13  ;;  %v1127_v13 = vrot.slane %v3177_v50, 5 }
  0xfa   : > { %v1274_v42 = vpop.f32.mrf.mxu2 }
  0xfb   : > { %v1354_v18 = vadd.f32 %v1274_v42, %v954_v54  ;;  %v3611_v10 = vpack.c.b16 %v1185_v35, %v1184_v61  ;;  %v3618_v42 = vld [vmem:[%s3012_s11 + $0x78] sm:$0xff] }
  0xfc   : > { %2648 = vmatmul.msk.bf16.gmra.mxu3 %vm671_vm4, %v3594_v19 }
  0xfe   : > { %v1564_v2 = vpop.f32.mrf.mxu0 }
  0xff   : > { %v1408_v51 = vpop.f32.mrf.mxu3  ;;  %v958_v15 = vpop.f32.mrf.mxu1 }
 0x100   : > { %v1488_v31 = vadd.f32 %v1408_v51, %v1354_v18  ;;  %v959_v38 = vadd.f32 %v958_v15, %v3487_v39 }
 0x101   : > { %2665 = vmatmul.msk.bf16.gmra.mxu0 %vm671_vm4, %v3150_v4 }
 0x102   : > { %v1276_v54 = vpop.f32.mrf.mxu2  ;;  %2595 = vmatmul.msk.bf16.gmra.mxu1 %vm671_vm4, %v3594_v19  ;;  %v3609_v32 = vadd.f32 %v1564_v2, %v1488_v31  ;;  %v2612_v2 = vrot.slane %v3166_v28, 9 }
 0x103   : > { %v1355_v60 = vadd.f32 %v1276_v54, %v956_v46  ;;  %v1126_v46 = vrot.slane %v1124_v21, 4 }
 0x104   : > { %v1125_v50 = vsel %vm3342_vm7, %v2612_v2, %v1124_v21 }
 0x105   : > { %v1128_v51 = vsel %vm3342_vm7, %v1126_v46, %v1127_v13  ;;  %v1134_v46 = vrot.slane %v3265_v49, 5 }
 0x106   : > { %v1566_v17 = vpop.f32.mrf.mxu0 }
 0x107   : > { %v1410_v18 = vpop.f32.mrf.mxu3  ;;  %2628 = vmatmul.msk.bf16.gmra.mxu2 %vm671_vm4, %v3611_v10  ;;  %v960_v39 = vpop.f32.mrf.mxu1 }
 0x108   : > { %v1489_v15 = vadd.f32 %v1410_v18, %v1355_v60  ;;  %v961_v47 = vadd.f32 %v960_v39, %v3508_v58  ;;  %v1186_v58 = vunpack.c.l.b16 %v1125_v50  ;;  %v1187_v18 = vunpack.c.l.b16 %v1128_v51  ;;  %v3644_v50 = vld [vmem:[%s3012_s11 + $0x84] sm:$0xff] }
 0x10a   : > { %v1279_v61 = vpop.f32.mrf.mxu2  ;;  %v3622_v35 = vadd.f32 %v1566_v17, %v1489_v15  ;;  %v3637_v13 = vpack.c.b16 %v1187_v18, %v1186_v58  ;;  %v1131_v15 = vrot.slane %v3260_v30, 5 }
 0x10b   : > { %v1356_v34 = vadd.f32 %v1279_v61, %v959_v38 }
 0x10c   : > { %2649 = vmatmul.msk.bf16.gmra.mxu3 %vm671_vm4, %v3618_v42 }
 0x10e   : > { %v1569_v31 = vpop.f32.mrf.mxu0 }
 0x10f   : > { %v1413_v54 = vpop.f32.mrf.mxu3  ;;  %v963_v60 = vpop.f32.mrf.mxu1 }
 0x110   : > { %v1490_v28 = vadd.f32 %v1413_v54, %v1356_v34  ;;  %v964_v17 = vadd.f32 %v963_v60, %v3530_v11 }
 0x111   : > { %2666 = vmatmul.msk.bf16.gmra.mxu0 %vm671_vm4, %v3235_v25 }
 0x112   : > { %v1281_v38 = vpop.f32.mrf.mxu2  ;;  %2596 = vmatmul.msk.bf16.gmra.mxu1 %vm671_vm4, %v3618_v42  ;;  %v3635_v21 = vadd.f32 %v1569_v31, %v1490_v28  ;;  %v4339_v31 = vld [vmem:[#allocation15_spill] sm:$0xff] }
 0x113   : > { %v1357_v39 = vadd.f32 %v1281_v38, %v961_v47  ;;  %v2613_v54 = vrot.slane %v4339_v31, 9  ;;  %v1133_v47 = vrot.slane %v1131_v15, 4 }
 0x115   : > { %v1132_v49 = vsel %vm3342_vm7, %v2613_v54, %v1131_v15  ;;  %v1135_v18 = vsel %vm3342_vm7, %v1133_v47, %v1134_v46  ;;  %v2817_v54 = vld [vmem:[%s3012_s11 + $0x94] sm:$0xf] }
 0x116   : > { %v1571_v2 = vpop.f32.mrf.mxu0  ;;  %v1138_v47 = vrot.slane %v2817_v54, 5 }
 0x117   : > { %v1415_v61 = vpop.f32.mrf.mxu3  ;;  %2629 = vmatmul.msk.bf16.gmra.mxu2 %vm671_vm4, %v3637_v13  ;;  %v965_v11 = vpop.f32.mrf.mxu1 }
 0x118   : > { %v1491_v34 = vadd.f32 %v1415_v61, %v1357_v39  ;;  %v966_v51 = vadd.f32 %v965_v11, %v3550_v24  ;;  %v1188_v39 = vunpack.c.l.b16 %v1132_v49  ;;  %v1189_v61 = vunpack.c.l.b16 %v1135_v18 }
 0x11a   : > { %v1284_v60 = vpop.f32.mrf.mxu2  ;;  %v3648_v58 = vadd.f32 %v1571_v2, %v1491_v34  ;;  %v3663_v31 = vpack.c.b16 %v1189_v61, %v1188_v39 }
 0x11b   : > { %v1358_v30 = vadd.f32 %v1284_v60, %v964_v17  ;;  %v4341_v17 = vld [vmem:[#allocation21_spill] sm:$0xff] }
 0x11c   : > { %4340 = vst [vmem:[#allocation15_spill] sm:$0xff] %v3648_v58  ;;  %2650 = vmatmul.msk.bf16.gmra.mxu3 %vm671_vm4, %v3644_v50 }
 0x11d   : > { %4343 = vst [vmem:[#allocation37_spill] sm:$0xff] %v3663_v31 }
 0x11e   : > { %v1574_v28 = vpop.f32.mrf.mxu0 }
 0x11f   : > { %v1418_v24 = vpop.f32.mrf.mxu3  ;;  %v968_v38 = vpop.f32.mrf.mxu1 }
 0x120   : > { %v1492_v11 = vadd.f32 %v1418_v24, %v1358_v30  ;;  %v969_v2 = vadd.f32 %v968_v38, %v3572_v7  ;;  %v2818_v30 = vld [vmem:[%s3012_s11 + $0x98] sm:$0x1]  ;;  %v3670_v38 = vld [vmem:[%s3012_s11 + $0x90] sm:$0xff] }
 0x121   : > { %2667 = vmatmul.msk.bf16.gmra.mxu0 %vm671_vm4, %v4341_v17  ;;  %v1141_v49 = vrot.slane %v2818_v30, 5  ;;  %4344 = vst [vmem:[#allocation38_spill] sm:$0xff] %v3670_v38 }
 0x122   : > { %v1286_v34 = vpop.f32.mrf.mxu2  ;;  %2597 = vmatmul.msk.bf16.gmra.mxu1 %vm671_vm4, %v3644_v50  ;;  %v3661_v15 = vadd.f32 %v1574_v28, %v1492_v11  ;;  %v2819_v28 = vld [vmem:[%s3012_s11 + $0x90] sm:$0xf] }
 0x123   : > { %v1359_v46 = vadd.f32 %v1286_v34, %v966_v51  ;;  %v2614_v11 = vrot.slane %v2819_v28, 9  ;;  %v1140_v51 = vrot.slane %v1138_v47, 4 }
 0x124   : > { %4342 = vst [vmem:[#allocation36_spill] sm:$0xff] %v3661_v15  ;;  %v2822_v15 = vld [vmem:[%s3012_s11 + $0x9c] sm:$0xf] }
 0x125   : > { %v1139_v54 = vsel %vm3342_vm7, %v2614_v11, %v1138_v47  ;;  %v2820_v11 = vld [vmem:[%s3012_s11 + $0xa0] sm:$0xf] }
 0x126   : > { %v1576_v60 = vpop.f32.mrf.mxu0 }
 0x127   : > { %v1420_v7 = vpop.f32.mrf.mxu3  ;;  %2630 = vmatmul.msk.bf16.gmra.mxu2 %vm671_vm4, %v3663_v31  ;;  %v970_v18 = vpop.f32.mrf.mxu1 }
 0x128   : > { %v1493_v24 = vadd.f32 %v1420_v7, %v1359_v46  ;;  %v971_v17 = vadd.f32 %v970_v18, %v3586_v5  ;;  %v1142_v46 = vsel %vm3342_vm7, %v1140_v51, %v1141_v49  ;;  %v1190_v18 = vunpack.c.l.b16 %v1139_v54 }
 0x129   : > { %v1191_v28 = vunpack.c.l.b16 %v1142_v46  ;;  %v1145_v51 = vrot.slane %v2820_v11, 5  ;;  %v2821_v46 = vld [vmem:[%s3012_s11 + $0xa4] sm:$0x1] }
 0x12a   : > { %v1289_v39 = vpop.f32.mrf.mxu2  ;;  %v3674_v61 = vadd.f32 %v1576_v60, %v1493_v24  ;;  %v4346_v60 = vld [vmem:[#allocation9_spill] sm:$0xff] }
 0x12b   : > { %v1360_v34 = vadd.f32 %v1289_v39, %v969_v2  ;;  %v3688_v49 = vpack.c.b16 %v1191_v28, %v1190_v18 }
 0x12c   : > { %4345 = vst [vmem:[#allocation39_spill] sm:$0xff] %v3674_v61  ;;  %2651 = vmatmul.msk.bf16.gmra.mxu3 %vm671_vm4, %v3670_v38  ;;  %v3695_v61 = vld [vmem:[%s3012_s11 + $0x9c] sm:$0xff] }
 0x12d   : > { %4348 = vst [vmem:[#allocation41_spill] sm:$0xff] %v3688_v49 }
 0x12e   : > { %v1579_v30 = vpop.f32.mrf.mxu0  ;;  %4349 = vst [vmem:[#allocation42_spill] sm:$0xff] %v3695_v61 }
 0x12f   : > { %v1423_v7 = vpop.f32.mrf.mxu3  ;;  %v973_v5 = vpop.f32.mrf.mxu1 }
 0x130   : > { %v1494_v31 = vadd.f32 %v1423_v7, %v1360_v34  ;;  %v1148_v7 = vrot.slane %v2821_v46, 5 }
 0x131   : > { %2668 = vmatmul.msk.bf16.gmra.mxu0 %vm671_vm4, %v4346_v60 }
 0x132   : > { %v1291_v2 = vpop.f32.mrf.mxu2  ;;  %2598 = vmatmul.msk.bf16.gmra.mxu1 %vm671_vm4, %v3670_v38  ;;  %v3686_v47 = vadd.f32 %v1579_v30, %v1494_v31  ;;  %v2615_v38 = vrot.slane %v2822_v15, 9  ;;  %v1147_v31 = vrot.slane %v1145_v51, 4 }
 0x133   : > { %v1361_v24 = vadd.f32 %v1291_v2, %v971_v17  ;;  %v974_v17 = vadd.f32 %v973_v5, %v3425_v22  ;;  %v4351_v5 = vld [vmem:[#allocation10_spill] sm:$0xff] }
 0x134   : > { %4347 = vst [vmem:[#allocation40_spill] sm:$0xff] %v3686_v47  ;;  %v1146_v2 = vsel %vm3342_vm7, %v2615_v38, %v1145_v51 }
 0x135   : > { %v1192_v15 = vunpack.c.l.b16 %v1146_v2 }
 0x136   : > { %v1581_v39 = vpop.f32.mrf.mxu0 }
 0x137   : > { %v1425_v54 = vpop.f32.mrf.mxu3  ;;  %2631 = vmatmul.msk.bf16.gmra.mxu2 %vm671_vm4, %v3688_v49  ;;  %v975_v34 = vpop.f32.mrf.mxu1 }
 0x138   : > { %v1495_v60 = vadd.f32 %v1425_v54, %v1361_v24  ;;  %v1149_v24 = vsel %vm3342_vm7, %v1147_v31, %v1148_v7  ;;  %v4354_v31 = vld [vmem:[#allocation12_spill] sm:$0xff] }
 0x139   : > { %v1193_v49 = vunpack.c.l.b16 %v1149_v24  ;;  %v4355_v24 = vld [vmem:[#allocation13_spill] sm:$0xff] }
 0x13a   : > { %v1294_v30 = vpop.f32.mrf.mxu2  ;;  %v3699_v18 = vadd.f32 %v1581_v39, %v1495_v60  ;;  %v976_v60 = vadd.f32 %v975_v34, %v3440_v43  ;;  %v3721_v34 = vld [vmem:[%s3012_s11 + $0xa8] sm:$0xff] }
 0x13b   : > { %v1362_v28 = vadd.f32 %v1294_v30, %v974_v17  ;;  %v3714_v7 = vpack.c.b16 %v1193_v49, %v1192_v15  ;;  %v1152_v17 = vrot.slane %v4354_v31, 5  ;;  %4356 = vst [vmem:[#allocation12_spill] sm:$0xff] %v3721_v34 }
 0x13c   : > { %4350 = vst [vmem:[#allocation43_spill] sm:$0xff] %v3699_v18  ;;  %2652 = vmatmul.msk.bf16.gmra.mxu3 %vm671_vm4, %v3695_v61 }
 0x13d   : > { %4353 = vst [vmem:[#allocation45_spill] sm:$0xff] %v3714_v7 }
 0x13e   : > { %v1584_v11 = vpop.f32.mrf.mxu0 }
 0x13f   : > { %v1428_v54 = vpop.f32.mrf.mxu3  ;;  %v978_v46 = vpop.f32.mrf.mxu1 }
 0x140   : > { %v1496_v22 = vadd.f32 %v1428_v54, %v1362_v28  ;;  %v1155_v54 = vrot.slane %v4355_v24, 5 }
 0x141   : > { %2669 = vmatmul.msk.bf16.gmra.mxu0 %vm671_vm4, %v4351_v5  ;;  %v4357_v5 = vld [vmem:[#allocation11_spill] sm:$0xff] }
 0x142   : > { %v1296_v39 = vpop.f32.mrf.mxu2  ;;  %2599 = vmatmul.msk.bf16.gmra.mxu1 %vm671_vm4, %v3695_v61  ;;  %v3712_v38 = vadd.f32 %v1584_v11, %v1496_v22  ;;  %v2616_v18 = vrot.slane %v4357_v5, 9  ;;  %v1154_v11 = vrot.slane %v1152_v17, 4  ;;  %v979_v22 = vadd.f32 %v978_v46, %v3460_v9 }
 0x143   : > { %v1363_v51 = vadd.f32 %v1296_v39, %v976_v60 }
 0x144   : > { %4352 = vst [vmem:[#allocation44_spill] sm:$0xff] %v3712_v38  ;;  %v1153_v39 = vsel %vm3342_vm7, %v2616_v18, %v1152_v17  ;;  %v3739_v18 = vld [vmem:[%s3012_s11 + $0xc0] sm:$0xf] }
 0x145   : > { %v1194_v24 = vunpack.c.l.b16 %v1153_v39  ;;  %4360 = vst [vmem:[#allocation11_spill] sm:$0xff] %v3739_v18  ;;  %v1521_v39 = vshrl.u32 %v3739_v18, 16 }
 0x146   : > { %v1586_v30 = vpop.f32.mrf.mxu0 }
 0x147   : > { %v1430_v2 = vpop.f32.mrf.mxu3  ;;  %2632 = vmatmul.msk.bf16.gmra.mxu2 %vm671_vm4, %v3714_v7  ;;  %v980_v28 = vpop.f32.mrf.mxu1  ;;  %v4359_v7 = vld [vmem:[#allocation16_spill] sm:$0xff] }
 0x148   : > { %v1497_v43 = vadd.f32 %v1430_v2, %v1363_v51  ;;  %v1156_v51 = vsel %vm3342_vm7, %v1154_v11, %v1155_v54 }
 0x149   : > { %v1195_v9 = vunpack.c.l.b16 %v1156_v51 }
 0x14a   : > { %v1299_v49 = vpop.f32.mrf.mxu2  ;;  %v3725_v15 = vadd.f32 %v1586_v30, %v1497_v43  ;;  %v981_v30 = vadd.f32 %v980_v28, %v3478_v29  ;;  %v1524_v29 = vshll.u32 %v3739_v18, 16 }
 0x14b   : > { %v1364_v60 = vadd.f32 %v1299_v49, %v979_v22  ;;  %v3743_v11 = vpack.c.b16 %v1195_v9, %v1194_v24  ;;  %v3746_v22 = vld [vmem:[%s3012_s11 + $0xc4] sm:$0xf]  ;;  %v4364_v49 = vld [vmem:[#allocation18_spill] sm:$0xff]  ;;  %v4365_v24 = vld [vmem:[#allocation19_spill] sm:$0xff] }
 0x14c   : > { %4358 = vst [vmem:[#allocation13_spill] sm:$0xff] %v3725_v15  ;;  %2653 = vmatmul.msk.bf16.gmra.mxu3 %vm671_vm4, %v3721_v34  ;;  %v1530_v28 = vshll.u32 %v3746_v22, 16  ;;  %v1162_v9 = vrot.slane %v4365_v24, 5  ;;  %v1523_v15 = vrot.slane %v1521_v39, 4  ;;  %v1526_v38 = vrot.slane %v1524_v29, 5 }
 0x14d   : > { %4362 = vst [vmem:[#allocation47_spill] sm:$0xff] %v3743_v11 }
 0x14e   : > { %v1589_v31 = vpop.f32.mrf.mxu0  ;;  %4363 = vst [vmem:[#allocation48_spill] sm:$0xff] %v3746_v22 }
 0x14f   : > { %v1433_v5 = vpop.f32.mrf.mxu3  ;;  %v983_v2 = vpop.f32.mrf.mxu1 }
 0x150   : > { %v1498_v46 = vadd.f32 %v1433_v5, %v1364_v60  ;;  %v1159_v60 = vrot.slane %v4364_v49, 5  ;;  %v1534_v5 = vshrl.u32 %v3746_v22, 16  ;;  %v984_v18 = vadd.f32 %v983_v2, %v3498_v48 }
 0x151   : > { %2670 = vmatmul.msk.bf16.gmra.mxu0 %vm671_vm4, %v4359_v7  ;;  %v1532_v22 = vrot.slane %v1530_v28, 5  ;;  %v1527_v2 = vor.u32 %v1526_v38, %v1523_v15 }
 0x152   : > { %v1301_v43 = vpop.f32.mrf.mxu2  ;;  %2600 = vmatmul.msk.bf16.gmra.mxu1 %vm671_vm4, %v3721_v34  ;;  %v3741_v17 = vadd.f32 %v1589_v31, %v1498_v46  ;;  %v1536_v61 = vrot.slane %v1534_v5, 4 }
 0x153   : > { %v1365_v54 = vadd.f32 %v1301_v43, %v981_v30  ;;  %v3757_v30 = vld [vmem:[%s3012_s11 + $0xb4] sm:$0xff]  ;;  %v4366_v43 = vld [vmem:[#allocation17_spill] sm:$0xff] }
 0x154   : > { %4361 = vst [vmem:[#allocation46_spill] sm:$0xff] %v3741_v17  ;;  %v2617_v49 = vrot.slane %v4366_v43, 9  ;;  %v1161_v17 = vrot.slane %v1159_v60, 4  ;;  %v1537_v39 = vor.u32 %v1536_v61, %v1532_v22 }
 0x156   : > { %v1591_v51 = vpop.f32.mrf.mxu0  ;;  %v1538_v38 = vrot.slane %v1537_v39, 4 }
 0x157   : > { %v1435_v7 = vpop.f32.mrf.mxu3  ;;  %2633 = vmatmul.msk.bf16.gmra.mxu2 %vm671_vm4, %v3743_v11  ;;  %v985_v31 = vpop.f32.mrf.mxu1  ;;  %v3764_v11 = vld [vmem:[%s3012_s11 + $0xc8] sm:$0x1] }
 0x158   : > { %v1499_v46 = vadd.f32 %v1435_v7, %v1365_v54  ;;  %v1160_v7 = vsel %vm3342_vm7, %v2617_v49, %v1159_v60  ;;  %v1163_v54 = vsel %vm3342_vm7, %v1161_v17, %v1162_v9  ;;  %v1540_v29 = vshll.u32 %v3764_v11, 16 }
 0x159   : > { %v1196_v5 = vunpack.c.l.b16 %v1160_v7  ;;  %v986_v24 = vadd.f32 %v985_v31, %v3519_v63  ;;  %v1528_v17 = vrot.slane %v1527_v2, 4 }
 0x15a   : > { %v1304_v34 = vpop.f32.mrf.mxu2  ;;  %v3761_v47 = vadd.f32 %v1591_v51, %v1499_v46  ;;  %v1542_v61 = vrot.slane %v1540_v29, 5 }
 0x15b   : > { %v1366_v58 = vadd.f32 %v1304_v34, %v984_v18  ;;  %v1197_v34 = vunpack.c.l.b16 %v1163_v54  ;;  %v3789_v54 = vld [vmem:[%s3012_s11 + $0xc0] sm:$0xff] }
 0x15c   : > { %2654 = vmatmul.msk.bf16.gmra.mxu3 %vm671_vm4, %v3757_v30  ;;  %v1543_v63 = vsel %vm3039_vm3, %v1538_v38, %v1542_v61 }
 0x15d   : > { %v3780_v46 = vpack.c.b16 %v1197_v34, %v1196_v5  ;;  %v1547_v39 = vunpack.c.l.b16 %v1543_v63 }
 0x15e   : > { %v1594_v48 = vpop.f32.mrf.mxu0 }
 0x15f   : > { %v1438_v28 = vpop.f32.mrf.mxu3  ;;  %v988_v51 = vpop.f32.mrf.mxu1 }
 0x160   : > { %v1500_v18 = vadd.f32 %v1438_v28, %v1366_v58  ;;  %v1533_v58 = vsel %vm3039_vm3, %v1528_v17, %v1532_v22 }
 0x161   : > { %2671 = vmatmul.msk.bf16.gmra.mxu0 %vm671_vm4, %v3351_v53  ;;  %v1546_v2 = vunpack.c.l.b16 %v1533_v58 }
 0x162   : > { %v1306_v60 = vpop.f32.mrf.mxu2  ;;  %2601 = vmatmul.msk.bf16.gmra.mxu1 %vm671_vm4, %v3757_v30  ;;  %v3778_v15 = vadd.f32 %v1594_v48, %v1500_v18  ;;  %v989_v48 = vadd.f32 %v988_v51, %v3540_v26 }
 0x163   : > { %v1367_v9 = vadd.f32 %v1306_v60, %v986_v24  ;;  %v3796_v22 = vpack.c.b16 %v1547_v39, %v1546_v2 }
 0x166   : > { %v1596_v43 = vpop.f32.mrf.mxu0 }
 0x167   : > { %v1440_v31 = vpop.f32.mrf.mxu3  ;;  %2634 = vmatmul.msk.bf16.gmra.mxu2 %vm671_vm4, %v3780_v46  ;;  %v990_v49 = vpop.f32.mrf.mxu1 }
 0x168   : > { %v1501_v7 = vadd.f32 %v1440_v31, %v1367_v9  ;;  %v991_v26 = vadd.f32 %v990_v49, %v3557_v0 }
 0x16a   : > { %v1309_v29 = vpop.f32.mrf.mxu2  ;;  %v3792_v28 = vadd.f32 %v1596_v43, %v1501_v7 }
 0x16b   : > { %v1368_v5 = vadd.f32 %v1309_v29, %v989_v48 }
 0x16c   : > { %2655 = vmatmul.msk.bf16.gmra.mxu3 %vm671_vm4, %v3789_v54 }
 0x16e   : > { %v1599_v34 = vpop.f32.mrf.mxu0 }
 0x16f   : > { %v1443_v18 = vpop.f32.mrf.mxu3  ;;  %v993_v24 = vpop.f32.mrf.mxu1 }
 0x170   : > { %v1502_v60 = vadd.f32 %v1443_v18, %v1368_v5  ;;  %v994_v63 = vadd.f32 %v993_v24, %v3442_v16 }
 0x171   : > { %2672 = vmatmul.msk.bf16.gmra.mxu0 %vm671_vm4, %v3796_v22 }
 0x172   : > { %v1311_v51 = vpop.f32.mrf.mxu2  ;;  %2675 = vmatmul.msk.bf16.vlgmr.msra.gmra.mxu1 %vm671_vm4, %v3376_v55  ;;  %v3803_v17 = vadd.f32 %v1599_v34, %v1502_v60 }
 0x173   : > { %v1369_v38 = vadd.f32 %v1311_v51, %v991_v26 }
 0x176   : > { %v1601_v61 = vpop.f32.mrf.mxu0 }
 0x177   : > { %v1445_v9 = vpop.f32.mrf.mxu3  ;;  %2696 = vmatmul.msk.bf16.vlgmr.msra.gmra.mxu2 %vm671_vm4, %v3388_v6  ;;  %v995_v43 = vpop.f32.mrf.mxu1 }
 0x178   : > { %v1503_v58 = vadd.f32 %v1445_v9, %v1369_v38  ;;  %v996_v6 = vadd.f32 %v995_v43, %v3464_v57 }
 0x17a   : > { %v1314_v31 = vpop.f32.mrf.mxu2  ;;  %v3808_v7 = vadd.f32 %v1601_v61, %v1503_v58 }
 0x17b   : > { %v1370_v0 = vadd.f32 %v1314_v31, %v994_v63 }
 0x17c   : > { %2713 = vmatmul.msk.bf16.vlgmr.msra.gmra.mxu3 %vm671_vm4, %v3279_v45 }
 0x17e   : > { %v1604_v55 = vpop.f32.mrf.mxu0 }
 0x17f   : > { %v1448_v49 = vpop.f32.mrf.mxu3  ;;  %v998_v48 = vpop.f32.mrf.mxu1 }
 0x180   : > { %v1504_v2 = vadd.f32 %v1448_v49, %v1370_v0  ;;  %v999_v24 = vadd.f32 %v998_v48, %v3484_v59 }
 0x181   : > { %2731 = vmatmul.msk.bf16.vlgmr.msra.gmra.mxu0 %vm671_vm4, %v3402_v52 }
 0x182   : > { %v1316_v39 = vpop.f32.mrf.mxu2  ;;  %2676 = vmatmul.msk.bf16.gmra.mxu1 %vm671_vm4, %v3402_v52  ;;  %v3817_v16 = vadd.f32 %v1604_v55, %v1504_v2 }
 0x183   : > { %v1371_v29 = vadd.f32 %v1316_v39, %v996_v6 }
 0x186   : > { %v1606_v5 = vpop.f32.mrf.mxu0 }
 0x187   : > { %v1450_v34 = vpop.f32.mrf.mxu3  ;;  %2697 = vmatmul.msk.bf16.gmra.mxu2 %vm671_vm4, %v3408_v41  ;;  %v1000_v45 = vpop.f32.mrf.mxu1 }
 0x188   : > { %v1505_v18 = vadd.f32 %v1450_v34, %v1371_v29  ;;  %v1001_v41 = vadd.f32 %v1000_v45, %v3502_v3 }
 0x18a   : > { %v1319_v60 = vpop.f32.mrf.mxu2  ;;  %v3822_v26 = vadd.f32 %v1606_v5, %v1505_v18 }
 0x18b   : > { %v1372_v57 = vadd.f32 %v1319_v60, %v999_v24 }
 0x18c   : > { %2714 = vmatmul.msk.bf16.gmra.mxu3 %vm671_vm4, %v3369_v20 }
 0x18e   : > { %v1609_v52 = vpop.f32.mrf.mxu0 }
 0x18f   : > { %v1453_v51 = vpop.f32.mrf.mxu3  ;;  %v1003_v38 = vpop.f32.mrf.mxu1 }
 0x190   : > { %v1506_v61 = vadd.f32 %v1453_v51, %v1372_v57  ;;  %v1004_v0 = vadd.f32 %v1003_v38, %v3521_v23 }
 0x191   : > { %2732 = vmatmul.msk.bf16.gmra.mxu0 %vm671_vm4, %v3422_v40 }
 0x192   : > { %v1321_v9 = vpop.f32.mrf.mxu2  ;;  %2677 = vmatmul.msk.bf16.gmra.mxu1 %vm671_vm4, %v3422_v40  ;;  %v3831_v59 = vadd.f32 %v1609_v52, %v1506_v61 }
 0x193   : > { %v1373_v43 = vadd.f32 %v1321_v9, %v1001_v41 }
 0x196   : > { %v1611_v58 = vpop.f32.mrf.mxu0 }
 0x197   : > { %v1455_v63 = vpop.f32.mrf.mxu3  ;;  %2698 = vmatmul.msk.bf16.gmra.mxu2 %vm671_vm4, %v3430_v8  ;;  %v1005_v20 = vpop.f32.mrf.mxu1 }
 0x198   : > { %v1507_v31 = vadd.f32 %v1455_v63, %v1373_v43  ;;  %v1006_v8 = vadd.f32 %v1005_v20, %v3542_v1  ;;  %v4367_v43 = vld [vmem:[#allocation24_spill] sm:$0xff]  ;;  %v4368_v63 = vld [vmem:[#allocation22_spill] sm:$0xff] }
 0x19a   : > { %v1324_v55 = vpop.f32.mrf.mxu2  ;;  %v3836_v49 = vadd.f32 %v1611_v58, %v1507_v31 }
 0x19b   : > { %v1374_v3 = vadd.f32 %v1324_v55, %v1004_v0  ;;  %v4369_v55 = vld [vmem:[#allocation14_spill] sm:$0xff] }
 0x19c   : > { %2715 = vmatmul.msk.bf16.gmra.mxu3 %vm671_vm4, %v3051_v62 }
 0x19e   : > { %v1614_v40 = vpop.f32.mrf.mxu0 }
 0x19f   : > { %v1458_v48 = vpop.f32.mrf.mxu3  ;;  %v1008_v2 = vpop.f32.mrf.mxu1 }
 0x1a0   : > { %v1508_v6 = vadd.f32 %v1458_v48, %v1374_v3  ;;  %v1009_v18 = vadd.f32 %v1008_v2, %v3564_v56  ;;  %v4370_v2 = vld [vmem:[#allocation27_spill] sm:$0xff] }
 0x1a1   : > { %2733 = vmatmul.msk.bf16.gmra.mxu0 %vm671_vm4, %v3450_v12 }
 0x1a2   : > { %v1326_v39 = vpop.f32.mrf.mxu2  ;;  %2678 = vmatmul.msk.bf16.gmra.mxu1 %vm671_vm4, %v3450_v12  ;;  %v3845_v23 = vadd.f32 %v1614_v40, %v1508_v6  ;;  %v4371_v6 = vld [vmem:[#allocation23_spill] sm:$0xff] }
 0x1a3   : > { %v1375_v29 = vadd.f32 %v1326_v39, %v1006_v8 }
 0x1a6   : > { %v1616_v5 = vpop.f32.mrf.mxu0 }
 0x1a7   : > { %v1460_v34 = vpop.f32.mrf.mxu3  ;;  %2699 = vmatmul.msk.bf16.gmra.mxu2 %vm671_vm4, %v3458_v27  ;;  %v1010_v62 = vpop.f32.mrf.mxu1 }
 0x1a8   : > { %v1509_v45 = vadd.f32 %v1460_v34, %v1375_v29  ;;  %v1011_v27 = vadd.f32 %v1010_v62, %v3579_v44 }
 0x1aa   : > { %v1329_v24 = vpop.f32.mrf.mxu2  ;;  %v3850_v60 = vadd.f32 %v1616_v5, %v1509_v45  ;;  %v4372_v45 = vld [vmem:[#allocation28_spill] sm:$0xff] }
 0x1ab   : > { %v1376_v1 = vadd.f32 %v1329_v24, %v1009_v18 }
 0x1ac   : > { %2716 = vmatmul.msk.bf16.gmra.mxu3 %vm671_vm4, %v3125_v37 }
 0x1ae   : > { %v1619_v12 = vpop.f32.mrf.mxu0 }
 0x1af   : > { %v1463_v57 = vpop.f32.mrf.mxu3  ;;  %v1013_v52 = vpop.f32.mrf.mxu1 }
 0x1b0   : > { %v1510_v51 = vadd.f32 %v1463_v57, %v1376_v1  ;;  %v1014_v20 = vadd.f32 %v1013_v52, %v4368_v63  ;;  %v4373_v1 = vld [vmem:[#allocation25_spill] sm:$0xff] }
 0x1b1   : > { %2734 = vmatmul.msk.bf16.gmra.mxu0 %vm671_vm4, %v3482_v33 }
 0x1b2   : > { %v1331_v38 = vpop.f32.mrf.mxu2  ;;  %2679 = vmatmul.msk.bf16.gmra.mxu1 %vm671_vm4, %v3482_v33  ;;  %v3859_v56 = vadd.f32 %v1619_v12, %v1510_v51 }
 0x1b3   : > { %v1377_v61 = vadd.f32 %v1331_v38, %v1011_v27  ;;  %v4374_v27 = vld [vmem:[#allocation20_spill] sm:$0xff] }
 0x1b6   : > { %v1621_v41 = vpop.f32.mrf.mxu0 }
 0x1b7   : > { %v1465_v9 = vpop.f32.mrf.mxu3  ;;  %2700 = vmatmul.msk.bf16.gmra.mxu2 %vm671_vm4, %v4367_v43  ;;  %v1015_v37 = vpop.f32.mrf.mxu1  ;;  %v4375_v43 = vld [vmem:[#allocation30_spill] sm:$0xff] }
 0x1b8   : > { %v1511_v58 = vadd.f32 %v1465_v9, %v1377_v61  ;;  %v1016_v8 = vadd.f32 %v1015_v37, %v4371_v6  ;;  %v4376_v37 = vld [vmem:[#allocation26_spill] sm:$0xff] }
 0x1ba   : > { %v1334_v31 = vpop.f32.mrf.mxu2  ;;  %v3864_v0 = vadd.f32 %v1621_v41, %v1511_v58 }
 0x1bb   : > { %v1378_v44 = vadd.f32 %v1334_v31, %v1014_v20 }
 0x1bc   : > { %2717 = vmatmul.msk.bf16.gmra.mxu3 %vm671_vm4, %v4369_v55 }
 0x1be   : > { %v1624_v33 = vpop.f32.mrf.mxu0 }
 0x1bf   : > { %v1468_v3 = vpop.f32.mrf.mxu3  ;;  %v1018_v40 = vpop.f32.mrf.mxu1 }
 0x1c0   : > { %v1512_v48 = vadd.f32 %v1468_v3, %v1378_v44  ;;  %v1019_v12 = vadd.f32 %v1018_v40, %v4373_v1  ;;  %v4381_v1 = vld [vmem:[#allocation31_spill] sm:$0xff] }
 0x1c1   : > { %2735 = vmatmul.msk.bf16.gmra.mxu0 %vm671_vm4, %v4370_v2 }
 0x1c2   : > { %v1336_v39 = vpop.f32.mrf.mxu2  ;;  %2680 = vmatmul.msk.bf16.gmra.mxu1 %vm671_vm4, %v4370_v2  ;;  %v3873_v29 = vadd.f32 %v1624_v33, %v1512_v48  ;;  %v4377_v33 = vld [vmem:[#allocation32_spill] sm:$0xff]  ;;  %v4378_v48 = vld [vmem:[#allocation29_spill] sm:$0xff] }
 0x1c3   : > { %v1379_v5 = vadd.f32 %v1336_v39, %v1016_v8 }
 0x1c6   : > { %v1626_v34 = vpop.f32.mrf.mxu0 }
 0x1c7   : > { %v1470_v62 = vpop.f32.mrf.mxu3  ;;  %2701 = vmatmul.msk.bf16.gmra.mxu2 %vm671_vm4, %v4372_v45  ;;  %v1020_v18 = vpop.f32.mrf.mxu1 }
 0x1c8   : > { %v1513_v24 = vadd.f32 %v1470_v62, %v1379_v5  ;;  %v1021_v58 = vadd.f32 %v1020_v18, %v4376_v37  ;;  %v4379_v5 = vld [vmem:[#allocation8_spill] sm:$0xff] }
 0x1ca   : > { %v1339_v57 = vpop.f32.mrf.mxu2  ;;  %v3878_v52 = vadd.f32 %v1626_v34, %v1513_v24  ;;  %v4380_v24 = vld [vmem:[#allocation34_spill] sm:$0xff] }
 0x1cb   : > { %v1380_v51 = vadd.f32 %v1339_v57, %v1019_v12 }
 0x1cc   : > { %2718 = vmatmul.msk.bf16.gmra.mxu3 %vm671_vm4, %v4374_v27 }
 0x1ce   : > { %v1629_v38 = vpop.f32.mrf.mxu0 }
 0x1cf   : > { %v1473_v61 = vpop.f32.mrf.mxu3  ;;  %v1023_v41 = vpop.f32.mrf.mxu1 }
 0x1d0   : > { %v1514_v9 = vadd.f32 %v1473_v61, %v1380_v51  ;;  %v1024_v2 = vadd.f32 %v1023_v41, %v4378_v48 }
 0x1d1   : > { %2736 = vmatmul.msk.bf16.gmra.mxu0 %vm671_vm4, %v4375_v43 }
 0x1d2   : > { %v1341_v63 = vpop.f32.mrf.mxu2  ;;  %2681 = vmatmul.msk.bf16.gmra.mxu1 %vm671_vm4, %v4375_v43  ;;  %v3887_v20 = vadd.f32 %v1629_v38, %v1514_v9  ;;  %v4382_v43 = vld [vmem:[#allocation33_spill] sm:$0xff] }
 0x1d3   : > { %v1381_v31 = vadd.f32 %v1341_v63, %v1021_v58 }
 0x1d6   : > { %v1631_v44 = vpop.f32.mrf.mxu0 }
 0x1d7   : > { %v1475_v55 = vpop.f32.mrf.mxu3  ;;  %2702 = vmatmul.msk.bf16.gmra.mxu2 %vm671_vm4, %v4377_v33  ;;  %v1025_v3 = vpop.f32.mrf.mxu1 }
 0x1d8   : > { %v1515_v40 = vadd.f32 %v1475_v55, %v1381_v31  ;;  %v1026_v12 = vadd.f32 %v1025_v3, %v4381_v1 }
 0x1da   : > { %v1344_v6 = vpop.f32.mrf.mxu2  ;;  %v3892_v8 = vadd.f32 %v1631_v44, %v1515_v40 }
 0x1db   : > { %v1382_v39 = vadd.f32 %v1344_v6, %v1024_v2 }
 0x1dc   : > { %2719 = vmatmul.msk.bf16.gmra.mxu3 %vm671_vm4, %v4379_v5 }
 0x1de   : > { %v1634_v34 = vpop.f32.mrf.mxu0 }
 0x1df   : > { %v1478_v62 = vpop.f32.mrf.mxu3  ;;  %v1028_v45 = vpop.f32.mrf.mxu1 }
 0x1e0   : > { %v1516_v18 = vadd.f32 %v1478_v62, %v1382_v39  ;;  %v1029_v37 = vadd.f32 %v1028_v45, %v4382_v43  ;;  %v4384_v43 = vld [vmem:[#allocation15_spill] sm:$0xff] }
 0x1e1   : > { %2737 = vmatmul.msk.bf16.gmra.mxu0 %vm671_vm4, %v4380_v24 }
 0x1e2   : > { %v1346_v57 = vpop.f32.mrf.mxu2  ;;  %2682 = vmatmul.msk.bf16.gmra.mxu1 %vm671_vm4, %v4380_v24  ;;  %v3901_v51 = vadd.f32 %v1634_v34, %v1516_v18 }
 0x1e3   : > { %v1383_v27 = vadd.f32 %v1346_v57, %v1026_v12 }
 0x1e6   : > { %v1636_v38 = vpop.f32.mrf.mxu0 }
 0x1e7   : > { %v1480_v61 = vpop.f32.mrf.mxu3  ;;  %2703 = vmatmul.msk.bf16.gmra.mxu2 %vm671_vm4, %v3594_v19  ;;  %v1030_v41 = vpop.f32.mrf.mxu1  ;;  %v4383_v19 = vld [vmem:[#allocation35_spill] sm:$0xff] }
 0x1e8   : > { %v1517_v9 = vadd.f32 %v1480_v61, %v1383_v27  ;;  %v1031_v48 = vadd.f32 %v1030_v41, %v4383_v19 }
 0x1ea   : > { %v1349_v58 = vpop.f32.mrf.mxu2  ;;  %v3906_v63 = vadd.f32 %v1636_v38, %v1517_v9 }
 0x1eb   : > { %v1384_v31 = vadd.f32 %v1349_v58, %v1029_v37 }
 0x1ec   : > { %2720 = vmatmul.msk.bf16.gmra.mxu3 %vm671_vm4, %v3150_v4 }
 0x1ee   : > { %v1639_v44 = vpop.f32.mrf.mxu0 }
 0x1ef   : > { %v1483_v55 = vpop.f32.mrf.mxu3  ;;  %v1704_v33 = vpop.f32.mrf.mxu1 }
 0x1f0   : > { %v1518_v3 = vadd.f32 %v1483_v55, %v1384_v31  ;;  %v1784_v40 = vadd.f32 %v1704_v33, %v3609_v32 }
 0x1f1   : > { %2738 = vmatmul.msk.bf16.gmra.mxu0 %vm671_vm4, %v3611_v10 }
 0x1f2   : > { %v1351_v2 = vpop.f32.mrf.mxu2  ;;  %2683 = vmatmul.msk.bf16.gmra.mxu1 %vm671_vm4, %v3611_v10  ;;  %v3916_v6 = vadd.f32 %v1639_v44, %v1518_v3  ;;  %v4385_v44 = vld [vmem:[#allocation21_spill] sm:$0xff] }
 0x1f3   : > { %v1385_v39 = vadd.f32 %v1351_v2, %v1031_v48  ;;  %v4387_v48 = vld [vmem:[#allocation37_spill] sm:$0xff] }
 0x1f6   : > { %v1641_v5 = vpop.f32.mrf.mxu0 }
 0x1f7   : > { %v1485_v4 = vpop.f32.mrf.mxu3  ;;  %2704 = vmatmul.msk.bf16.gmra.mxu2 %vm671_vm4, %v3618_v42  ;;  %v1706_v34 = vpop.f32.mrf.mxu1 }
 0x1f8   : > { %v1519_v62 = vadd.f32 %v1485_v4, %v1385_v39  ;;  %v1785_v32 = vadd.f32 %v1706_v34, %v3622_v35  ;;  %v4388_v34 = vld [vmem:[#allocation38_spill] sm:$0xff] }
 0x1fa   : > { %v1838_v45 = vpop.f32.mrf.mxu2  ;;  %v3921_v18 = vadd.f32 %v1641_v5, %v1519_v62 }
 0x1fb   : > { %v1918_v24 = vadd.f32 %v1838_v45, %v1784_v40  ;;  %v4386_v40 = vld [vmem:[#allocation36_spill] sm:$0xff]  ;;  %v4389_v45 = vld [vmem:[#allocation39_spill] sm:$0xff] }
 0x1fc   : > { %2721 = vmatmul.msk.bf16.gmra.mxu3 %vm671_vm4, %v3235_v25 }
 0x1fe   : > { %v2134_v10 = vpop.f32.mrf.mxu0 }
 0x1ff   : > { %v1994_v1 = vpop.f32.mrf.mxu3  ;;  %v1709_v12 = vpop.f32.mrf.mxu1 }
 0x200   : > { %v2074_v57 = vadd.f32 %v1994_v1, %v1918_v24  ;;  %v1786_v27 = vadd.f32 %v1709_v12, %v3635_v21 }
 0x201   : > { %2739 = vmatmul.msk.bf16.gmra.mxu0 %vm671_vm4, %v3637_v13 }
 0x202   : > { %v3928_v42 = vadd.f32 %v2134_v10, %v2074_v57  ;;  %v1840_v38 = vpop.f32.mrf.mxu2  ;;  %2684 = vmatmul.msk.bf16.gmra.mxu1 %vm671_vm4, %v3637_v13  ;;  %v4390_v57 = vld [vmem:[#allocation9_spill] sm:$0xff] }
 0x203   : > { %v1919_v35 = vadd.f32 %v1840_v38, %v1785_v32 }
 0x206   : > { %v2136_v61 = vpop.f32.mrf.mxu0 }
 0x207   : > { %v1996_v41 = vpop.f32.mrf.mxu3  ;;  %2705 = vmatmul.msk.bf16.gmra.mxu2 %vm671_vm4, %v3644_v50  ;;  %v1711_v25 = vpop.f32.mrf.mxu1 }
 0x208   : > { %v2075_v9 = vadd.f32 %v1996_v41, %v1919_v35  ;;  %v1787_v37 = vadd.f32 %v1711_v25, %v4384_v43  ;;  %v4391_v41 = vld [vmem:[#allocation40_spill] sm:$0xff] }
 0x20a   : > { %v3935_v21 = vadd.f32 %v2136_v61, %v2075_v9  ;;  %v1843_v58 = vpop.f32.mrf.mxu2  ;;  %v4392_v9 = vld [vmem:[#allocation41_spill] sm:$0xff] }
 0x20b   : > { %v1920_v31 = vadd.f32 %v1843_v58, %v1786_v27 }
 0x20c   : > { %2722 = vmatmul.msk.bf16.gmra.mxu3 %vm671_vm4, %v4385_v44 }
 0x20e   : > { %v2139_v55 = vpop.f32.mrf.mxu0 }
 0x20f   : > { %v1999_v33 = vpop.f32.mrf.mxu3  ;;  %v1714_v13 = vpop.f32.mrf.mxu1 }
 0x210   : > { %v2076_v3 = vadd.f32 %v1999_v33, %v1920_v31  ;;  %v1788_v19 = vadd.f32 %v1714_v13, %v4386_v40 }
 0x211   : > { %2740 = vmatmul.msk.bf16.gmra.mxu0 %vm671_vm4, %v4387_v48 }
 0x212   : > { %v3942_v50 = vadd.f32 %v2139_v55, %v2076_v3  ;;  %v1845_v2 = vpop.f32.mrf.mxu2  ;;  %2685 = vmatmul.msk.bf16.gmra.mxu1 %vm671_vm4, %v4387_v48  ;;  %v4393_v55 = vld [vmem:[#allocation42_spill] sm:$0xff]  ;;  %v4394_v3 = vld [vmem:[#allocation43_spill] sm:$0xff] }
 0x213   : > { %v1921_v39 = vadd.f32 %v1845_v2, %v1787_v37 }
 0x216   : > { %v2141_v5 = vpop.f32.mrf.mxu0 }
 0x217   : > { %v2001_v4 = vpop.f32.mrf.mxu3  ;;  %2706 = vmatmul.msk.bf16.gmra.mxu2 %vm671_vm4, %v4388_v34  ;;  %v1716_v62 = vpop.f32.mrf.mxu1 }
 0x218   : > { %v2077_v32 = vadd.f32 %v2001_v4, %v1921_v39  ;;  %v1789_v24 = vadd.f32 %v1716_v62, %v4389_v45  ;;  %v4395_v39 = vld [vmem:[#allocation10_spill] sm:$0xff] }
 0x21a   : > { %v3949_v10 = vadd.f32 %v2141_v5, %v2077_v32  ;;  %v1848_v1 = vpop.f32.mrf.mxu2  ;;  %v4396_v32 = vld [vmem:[#allocation44_spill] sm:$0xff] }
 0x21b   : > { %v1922_v12 = vadd.f32 %v1848_v1, %v1788_v19 }
 0x21c   : > { %2723 = vmatmul.msk.bf16.gmra.mxu3 %vm671_vm4, %v4390_v57 }
 0x21e   : > { %v2144_v27 = vpop.f32.mrf.mxu0 }
 0x21f   : > { %v2004_v38 = vpop.f32.mrf.mxu3  ;;  %v1719_v35 = vpop.f32.mrf.mxu1 }
 0x220   : > { %v2078_v61 = vadd.f32 %v2004_v38, %v1922_v12  ;;  %v1790_v25 = vadd.f32 %v1719_v35, %v4391_v41  ;;  %v4398_v35 = vld [vmem:[#allocation12_spill] sm:$0xff] }
 0x221   : > { %2741 = vmatmul.msk.bf16.gmra.mxu0 %vm671_vm4, %v4392_v9 }
 0x222   : > { %v3956_v43 = vadd.f32 %v2144_v27, %v2078_v61  ;;  %v1850_v37 = vpop.f32.mrf.mxu2  ;;  %2686 = vmatmul.msk.bf16.gmra.mxu1 %vm671_vm4, %v4392_v9 }
 0x223   : > { %v1923_v58 = vadd.f32 %v1850_v37, %v1789_v24  ;;  %v4397_v24 = vld [vmem:[#allocation45_spill] sm:$0xff] }
 0x226   : > { %v2146_v31 = vpop.f32.mrf.mxu0 }
 0x227   : > { %v2006_v44 = vpop.f32.mrf.mxu3  ;;  %2707 = vmatmul.msk.bf16.gmra.mxu2 %vm671_vm4, %v4393_v55  ;;  %v1721_v33 = vpop.f32.mrf.mxu1 }
 0x228   : > { %v2079_v13 = vadd.f32 %v2006_v44, %v1923_v58  ;;  %v1791_v40 = vadd.f32 %v1721_v33, %v4394_v3  ;;  %v4400_v44 = vld [vmem:[#allocation16_spill] sm:$0xff] }
 0x22a   : > { %v3963_v19 = vadd.f32 %v2146_v31, %v2079_v13  ;;  %v1853_v48 = vpop.f32.mrf.mxu2 }
 0x22b   : > { %v1924_v2 = vadd.f32 %v1853_v48, %v1790_v25  ;;  %v4399_v25 = vld [vmem:[#allocation13_spill] sm:$0xff] }
 0x22c   : > { %2724 = vmatmul.msk.bf16.gmra.mxu3 %vm671_vm4, %v4395_v39 }
 0x22e   : > { %v2149_v5 = vpop.f32.mrf.mxu0 }
 0x22f   : > { %v2009_v4 = vpop.f32.mrf.mxu3  ;;  %v1724_v34 = vpop.f32.mrf.mxu1 }
 0x230   : > { %v2080_v62 = vadd.f32 %v2009_v4, %v1924_v2  ;;  %v1792_v45 = vadd.f32 %v1724_v34, %v4396_v32  ;;  %v4402_v2 = vld [vmem:[#allocation47_spill] sm:$0xff] }
 0x231   : > { %2742 = vmatmul.msk.bf16.gmra.mxu0 %vm671_vm4, %v4397_v24 }
 0x232   : > { %v3970_v1 = vadd.f32 %v2149_v5, %v2080_v62  ;;  %v1855_v12 = vpop.f32.mrf.mxu2  ;;  %2687 = vmatmul.msk.bf16.gmra.mxu1 %vm671_vm4, %v4397_v24 }
 0x233   : > { %v1925_v57 = vadd.f32 %v1855_v12, %v1791_v40  ;;  %v4401_v40 = vld [vmem:[#allocation46_spill] sm:$0xff] }
 0x236   : > { %v2151_v27 = vpop.f32.mrf.mxu0 }
 0x237   : > { %v2011_v38 = vpop.f32.mrf.mxu3  ;;  %2708 = vmatmul.msk.bf16.gmra.mxu2 %vm671_vm4, %v4398_v35  ;;  %v1726_v61 = vpop.f32.mrf.mxu1  ;;  %v4403_v35 = vld [vmem:[#allocation48_spill] sm:$0xff] }
 0x238   : > { %v2081_v41 = vadd.f32 %v2011_v38, %v1925_v57  ;;  %v1793_v9 = vadd.f32 %v1726_v61, %v4399_v25  ;;  %v1679_v61 = vrot.slane %v4403_v35, 5  ;;  %v4000_v25 = vld [vmem:[%s3012_s11 + $0xd0] sm:$0xf] }
 0x23a   : > { %v3977_v37 = vadd.f32 %v2151_v27, %v2081_v41  ;;  %v1858_v58 = vpop.f32.mrf.mxu2  ;;  %v3997_v41 = vld [vmem:[%s3012_s11 + $0xcc] sm:$0xf] }
 0x23b   : > { %v1926_v31 = vadd.f32 %v1858_v58, %v1792_v45 }
 0x23c   : > { %2725 = vmatmul.msk.bf16.gmra.mxu3 %vm671_vm4, %v4400_v44 }
 0x23e   : > { %v2154_v55 = vpop.f32.mrf.mxu0 }
 0x23f   : > { %v2014_v33 = vpop.f32.mrf.mxu3  ;;  %v1729_v13 = vpop.f32.mrf.mxu1 }
 0x240   : > { %v2082_v3 = vadd.f32 %v2014_v33, %v1926_v31  ;;  %v1794_v48 = vadd.f32 %v1729_v13, %v4401_v40  ;;  %v1960_v33 = vshll.u32 %v4000_v25, 16  ;;  %v1964_v13 = vshrl.u32 %v4000_v25, 16 }
 0x241   : > { %2743 = vmatmul.msk.bf16.gmra.mxu0 %vm671_vm4, %v4402_v2 }
 0x242   : > { %v3984_v39 = vadd.f32 %v2154_v55, %v2082_v3  ;;  %v1860_v5 = vpop.f32.mrf.mxu2  ;;  %2688 = vmatmul.msk.bf16.gmra.mxu1 %vm671_vm4, %v4402_v2  ;;  %v1951_v55 = vshrl.u32 %v3997_v41, 16 }
 0x243   : > { %v1927_v4 = vadd.f32 %v1860_v5, %v1793_v9 }
 0x246   : > { %v2156_v34 = vpop.f32.mrf.mxu0 }
 0x247   : > { %v2016_v62 = vpop.f32.mrf.mxu3  ;;  %2709 = vmatmul.msk.bf16.gmra.mxu2 %vm671_vm4, %v3757_v30  ;;  %v1731_v32 = vpop.f32.mrf.mxu1 }
 0x248   : > { %v2083_v45 = vadd.f32 %v2016_v62, %v1927_v4  ;;  %v1795_v24 = vadd.f32 %v1731_v32, %v3761_v47  ;;  %v4404_v47 = vld [vmem:[#allocation11_spill] sm:$0xff]  ;;  %v1953_v4 = vrot.slane %v1951_v55, 4  ;;  %v1962_v62 = vrot.slane %v1960_v33, 5 }
 0x249   : > { %v2673_v44 = vrot.slane %v4404_v47, 9  ;;  %v1966_v32 = vrot.slane %v1964_v13, 4 }
 0x24a   : > { %v3991_v12 = vadd.f32 %v2156_v34, %v2083_v45  ;;  %v1863_v57 = vpop.f32.mrf.mxu2 }
 0x24b   : > { %v1928_v27 = vadd.f32 %v1863_v57, %v1794_v48  ;;  %v1682_v48 = vrot.slane %v3764_v11, 5  ;;  %v1680_v5 = vsel %vm3342_vm7, %v2673_v44, %v1679_v61 }
 0x24c   : > { %2726 = vmatmul.msk.bf16.gmra.mxu3 %vm671_vm4, %v3351_v53  ;;  %v1954_v53 = vshll.u32 %v3997_v41, 16  ;;  %v1686_v11 = vunpack.c.l.b16 %v1680_v5 }
 0x24e   : > { %v2159_v38 = vpop.f32.mrf.mxu0  ;;  %v1956_v34 = vrot.slane %v1954_v53, 5 }
 0x24f   : > { %v2019_v9 = vpop.f32.mrf.mxu3  ;;  %v1734_v30 = vpop.f32.mrf.mxu1 }
 0x250   : > { %v2084_v58 = vadd.f32 %v2019_v9, %v1928_v27  ;;  %v1796_v31 = vadd.f32 %v1734_v30, %v3778_v15  ;;  %v1681_v15 = vrot.slane %v1679_v61, 4  ;;  %v232_v27 = vld [vmem:[%s3012_s11 + $0xd4] sm:$0x1]  ;;  %v1957_v61 = vor.u32 %v1956_v34, %v1953_v4 }
 0x251   : > { %2744 = vmatmul.msk.bf16.gmra.mxu0 %vm671_vm4, %v3780_v46  ;;  %v1967_v30 = vor.u32 %v1966_v32, %v1962_v62 }
 0x252   : > { %v4010_v3 = vadd.f32 %v2159_v38, %v2084_v58  ;;  %v1865_v40 = vpop.f32.mrf.mxu2  ;;  %2689 = vmatmul.msk.bf16.gmra.mxu1 %vm671_vm4, %v3780_v46  ;;  %v1683_v57 = vsel %vm3342_vm7, %v1681_v15, %v1682_v48  ;;  %v1970_v58 = vshll.u32 %v232_v27, 16  ;;  %v1958_v33 = vrot.slane %v1957_v61, 4 }
 0x253   : > { %v1929_v2 = vadd.f32 %v1865_v40, %v1795_v24  ;;  %v1687_v9 = vunpack.c.l.b16 %v1683_v57  ;;  %v1968_v13 = vrot.slane %v1967_v30, 4  ;;  %v2109_v15 = vrot.slane %v4000_v25, 5 }
 0x254   : > { %v2729_v25 = vrot.slane %v3997_v41, 9 }
 0x255   : > { %v1688_v53 = vpack.c.b16 %v1687_v9, %v1686_v11  ;;  %v2111_v32 = vrot.slane %v2109_v15, 4 }
 0x256   : > { %v2161_v45 = vpop.f32.mrf.mxu0 }
 0x257   : > { %v2021_v38 = vpop.f32.mrf.mxu3  ;;  %2710 = vmatmul.msk.bf16.gmra.mxu2 %vm671_vm4, %v3789_v54  ;;  %v1736_v46 = vpop.f32.mrf.mxu1  ;;  %v1972_v54 = vrot.slane %v1970_v58, 5 }
 0x258   : > { %v2085_v35 = vadd.f32 %v2021_v38, %v1929_v2  ;;  %v1797_v24 = vadd.f32 %v1736_v46, %v3792_v28  ;;  %v2766_v38 = vld [vmem:[%s3012_s11 + $0xcc] sm:$0xff]  ;;  %s2839_s11 = scalar_lea.hbm %s2838_s10, 1 }
 0x259   : > { %p2840_p11 = scmp.ne.s32.totalorder %s2838_s10, %s2839_s11  ;;  %p2845_p1 = scmp.lt.s32.totalorder %s2843_s20, %s2839_s11 }
 0x25a   : > { %v4023_v47 = vadd.f32 %v2161_v45, %v2085_v35  ;;  %v1868_v44 = vpop.f32.mrf.mxu2  ;;  %v2112_v45 = vrot.slane %v232_v27, 5 }
 0x25b   : > { %v1930_v55 = vadd.f32 %v1868_v44, %v1796_v31  ;;  %v1963_v31 = vsel %vm3039_vm3, %v1958_v33, %v1962_v62  ;;  %v2110_v62 = vsel %vm3342_vm7, %v2729_v25, %v2109_v15  ;;  %p2841_p12 = pnand %p2840_p11, %p2977_p5  ;;  %p2846_p2 = por %p2845_p1, %p2844_p0 }
 0x25c   : > { %2727 = vmatmul.msk.bf16.gmra.mxu3 %vm671_vm4, %v3796_v22  ;;  %v1973_v22 = vsel %vm3039_vm3, %v1968_v13, %v1972_v54  ;;  %v2113_v36 = vsel %vm3342_vm7, %v2111_v32, %v2112_v45  ;;  %v2116_v27 = vunpack.c.l.b16 %v2110_v62 }
 0x25d   : > { %v1977_v46 = vunpack.c.l.b16 %v1973_v22  ;;  %p2842_p13 = pneg %p2841_p12 }
 0x25e   : > { %v2164_v40 = vpop.f32.mrf.mxu0 }
 0x25f   : > { %v2024_v28 = vpop.f32.mrf.mxu3  ;;  %v1739_v48 = vpop.f32.mrf.mxu1  ;;  %p2847_p3 = pnand %p2846_p2, %p2842_p13 }
 0x260   : > { %v2086_v2 = vadd.f32 %v2024_v28, %v1930_v55  ;;  %v1798_v5 = vadd.f32 %v1739_v48, %v3803_v17  ;;  %v1976_v17 = vunpack.c.l.b16 %v1963_v31 }
 0x261   : > { %2745 = vmatmul.msk.bf16.gmra.mxu0 %vm671_vm4, %v1688_v53 }
 0x262   : > { %v4034_v4 = vadd.f32 %v2164_v40, %v2086_v2  ;;  %v1870_v34 = vpop.f32.mrf.mxu2  ;;  %2690 = vmatmul.msk.bf16.gmra.mxu1 %vm671_vm4, %v1688_v53  ;;  %v1978_v30 = vpack.c.b16 %v1977_v46, %v1976_v17 }
 0x263   : > { %v1931_v57 = vadd.f32 %v1870_v34, %v1797_v24  ;;  %v2117_v24 = vunpack.c.l.b16 %v2113_v36 }
 0x265   : > { %v2118_v53 = vpack.c.b16 %v2117_v24, %v2116_v27 }
 0x266   : > { %v2166_v35 = vpop.f32.mrf.mxu0 }
 0x267   : > { %v2026_v11 = vpop.f32.mrf.mxu3  ;;  %2711 = vmatmul.msk.bf16.gmra.mxu2 %vm671_vm4, %v2766_v38  ;;  %v1741_v9 = vpop.f32.mrf.mxu1 }
 0x268   : > { %v2087_v61 = vadd.f32 %v2026_v11, %v1931_v57  ;;  %v1799_v41 = vadd.f32 %v1741_v9, %v3808_v7 }
 0x26a   : > { %v4045_v58 = vadd.f32 %v2166_v35, %v2087_v61  ;;  %v1873_v44 = vpop.f32.mrf.mxu2 }
 0x26b   : > { %v1932_v55 = vadd.f32 %v1873_v44, %v1798_v5 }
 0x26c   : > { %4405 = vst [vmem:[#allocation18_spill] sm:$0xff] %v4045_v58  ;;  %2728 = vmatmul.msk.bf16.gmra.mxu3 %vm671_vm4, %v1978_v30 }
 0x26e   : > { %v2169_v33 = vpop.f32.mrf.mxu0 }
 0x26f   : > { %v2029_v14 = vpop.f32.mrf.mxu3  ;;  %v1744_v13 = vpop.f32.mrf.mxu1 }
 0x270   : > { %v2088_v54 = vadd.f32 %v2029_v14, %v1932_v55  ;;  %v1800_v40 = vadd.f32 %v1744_v13, %v3817_v16 }
 0x271   : > { %2746 = vmatmul.msk.bf16.gmra.mxu0 %vm671_vm4, %v2118_v53 }
 0x272   : > { %v4050_v15 = vadd.f32 %v2169_v33, %v2088_v54  ;;  %v1875_v7 = vpop.f32.mrf.mxu2 }
 0x273   : > { %v1933_v28 = vadd.f32 %v1875_v7, %v1799_v41 }
 0x276   : > { %v2171_v48 = vpop.f32.mrf.mxu0 }
 0x277   : > { %v2031_v2 = vpop.f32.mrf.mxu3  ;;  %v1746_v31 = vpop.f32.mrf.mxu1 }
 0x278   : > { %v2089_v22 = vadd.f32 %v2031_v2, %v1933_v28  ;;  %v1801_v5 = vadd.f32 %v1746_v31, %v3822_v26 }
 0x27a   : > { %v4053_v34 = vadd.f32 %v2171_v48, %v2089_v22  ;;  %v1878_v25 = vpop.f32.mrf.mxu2 }
 0x27b   : > { %v1934_v32 = vadd.f32 %v1878_v25, %v1800_v40 }
 0x27e   : > { %v2174_v45 = vpop.f32.mrf.mxu0 }
 0x27f   : > { %v2034_v57 = vpop.f32.mrf.mxu3  ;;  %v1749_v38 = vpop.f32.mrf.mxu1 }
 0x280   : > { %v2090_v16 = vadd.f32 %v2034_v57, %v1934_v32  ;;  %v1802_v17 = vadd.f32 %v1749_v38, %v3831_v59  ;;  %v2246_v57 = vadd.f32 %v3935_v21, %v3928_v42 }
 0x282   : > { %v4056_v46 = vadd.f32 %v2174_v45, %v2090_v16  ;;  %v1880_v35 = vpop.f32.mrf.mxu2 }
 0x283   : > { %v1935_v62 = vadd.f32 %v1880_v35, %v1801_v5 }
 0x286   : > { %v2176_v36 = vpop.f32.mrf.mxu0 }
 0x287   : > { %v2036_v11 = vpop.f32.mrf.mxu3  ;;  %v1751_v9 = vpop.f32.mrf.mxu1 }
 0x288   : > { %v2091_v61 = vadd.f32 %v2036_v11, %v1935_v62  ;;  %v1803_v26 = vadd.f32 %v1751_v9, %v3836_v49 }
 0x28a   : > { %v4059_v30 = vadd.f32 %v2176_v36, %v2091_v61  ;;  %v1883_v41 = vpop.f32.mrf.mxu2 }
 0x28b   : > { %v1936_v27 = vadd.f32 %v1883_v41, %v1802_v17  ;;  %v2247_v17 = vadd.f32 %v2246_v57, %v3942_v50 }
 0x28d   : > { %v2248_v62 = vadd.f32 %v2247_v17, %v3949_v10 }
 0x28e   : > { %v2179_v24 = vpop.f32.mrf.mxu0 }
 0x28f   : > { %v2039_v44 = vpop.f32.mrf.mxu3  ;;  %v1754_v55 = vpop.f32.mrf.mxu1  ;;  %v2249_v36 = vadd.f32 %v2248_v62, %v3956_v43 }
 0x290   : > { %v2092_v53 = vadd.f32 %v2039_v44, %v1936_v27  ;;  %v1804_v59 = vadd.f32 %v1754_v55, %v3845_v23 }
 0x291   : > { %v2250_v9 = vadd.f32 %v2249_v36, %v3963_v19 }
 0x292   : > { %v4062_v33 = vadd.f32 %v2179_v24, %v2092_v53  ;;  %v1885_v14 = vpop.f32.mrf.mxu2 }
 0x293   : > { %v1937_v13 = vadd.f32 %v1885_v14, %v1803_v26  ;;  %v2251_v41 = vadd.f32 %v2250_v9, %v3970_v1 }
 0x295   : > { %v2252_v24 = vadd.f32 %v2251_v41, %v3977_v37 }
 0x296   : > { %v2181_v54 = vpop.f32.mrf.mxu0 }
 0x297   : > { %v2041_v40 = vpop.f32.mrf.mxu3  ;;  %v1756_v7 = vpop.f32.mrf.mxu1  ;;  %v2253_v44 = vadd.f32 %v2252_v24, %v3984_v39 }
 0x298   : > { %v2093_v28 = vadd.f32 %v2041_v40, %v1937_v13  ;;  %v1805_v57 = vadd.f32 %v1756_v7, %v3850_v60 }
 0x299   : > { %v2254_v53 = vadd.f32 %v2253_v44, %v3991_v12 }
 0x29a   : > { %v4064_v48 = vadd.f32 %v2181_v54, %v2093_v28  ;;  %v1888_v49 = vpop.f32.mrf.mxu2 }
 0x29b   : > { %v1938_v2 = vadd.f32 %v1888_v49, %v1804_v59  ;;  %v2255_v13 = vadd.f32 %v2254_v53, %v4010_v3 }
 0x29d   : > { %v2256_v40 = vadd.f32 %v2255_v13, %v4023_v47 }
 0x29e   : > { %v2184_v31 = vpop.f32.mrf.mxu0 }
 0x29f   : > { %v2044_v22 = vpop.f32.mrf.mxu3  ;;  %v1759_v5 = vpop.f32.mrf.mxu1  ;;  %v2257_v28 = vadd.f32 %v2256_v40, %v4034_v4 }
 0x2a0   : > { %v2094_v25 = vadd.f32 %v2044_v22, %v1938_v2  ;;  %v1806_v9 = vadd.f32 %v1759_v5, %v3859_v56 }
 0x2a1   : > { %v2258_v2 = vadd.f32 %v2257_v28, %v4045_v58 }
 0x2a2   : > { %v4066_v32 = vadd.f32 %v2184_v31, %v2094_v25  ;;  %v1890_v45 = vpop.f32.mrf.mxu2 }
 0x2a3   : > { %v2259_v25 = vadd.f32 %v2258_v2, %v4050_v15  ;;  %v1939_v36 = vadd.f32 %v1890_v45, %v1805_v57 }
 0x2a5   : > { %v2260_v62 = vadd.f32 %v2259_v25, %v4053_v34 }
 0x2a6   : > { %v2186_v23 = vpop.f32.mrf.mxu0 }
 0x2a7   : > { %v2046_v38 = vpop.f32.mrf.mxu3  ;;  %v1761_v16 = vpop.f32.mrf.mxu1  ;;  %v2261_v41 = vadd.f32 %v2260_v62, %v4056_v46 }
 0x2a8   : > { %v1807_v44 = vadd.f32 %v1761_v16, %v3864_v0  ;;  %v2095_v58 = vadd.f32 %v2046_v38, %v1939_v36 }
 0x2a9   : > { %v2262_v13 = vadd.f32 %v2261_v41, %v4059_v30 }
 0x2aa   : > { %v1893_v35 = vpop.f32.mrf.mxu2  ;;  %v4093_v57 = vadd.f32 %v2186_v23, %v2095_v58 }
 0x2ab   : > { %v1940_v24 = vadd.f32 %v1893_v35, %v1806_v9  ;;  %v2263_v7 = vadd.f32 %v2262_v13, %v4062_v33 }
 0x2ad   : > { %v2264_v35 = vadd.f32 %v2263_v7, %v4064_v48 }
 0x2ae   : > { %v2189_v11 = vpop.f32.mrf.mxu0 }
 0x2af   : > { %v2049_v61 = vpop.f32.mrf.mxu3  ;;  %v1764_v26 = vpop.f32.mrf.mxu1  ;;  %v2265_v38 = vadd.f32 %v2264_v35, %v4066_v32 }
 0x2b0   : > { %v1808_v60 = vadd.f32 %v1764_v26, %v3873_v29  ;;  %v2096_v25 = vadd.f32 %v2049_v61, %v1940_v24 }
 0x2b2   : > { %v1895_v27 = vpop.f32.mrf.mxu2 }
 0x2b3   : > { %v1941_v2 = vadd.f32 %v1895_v27, %v1807_v44  ;;  %v4097_v27 = vadd.f32 %v2189_v11, %v2096_v25 }
 0x2b6   : > { %v2191_v55 = vpop.f32.mrf.mxu0 }
 0x2b7   : > { %v2051_v59 = vpop.f32.mrf.mxu3  ;;  %v1766_v14 = vpop.f32.mrf.mxu1 }
 0x2b8   : > { %v1809_v56 = vadd.f32 %v1766_v14, %v3878_v52  ;;  %v2097_v0 = vadd.f32 %v2051_v59, %v1941_v2 }
 0x2ba   : > { %v1898_v54 = vpop.f32.mrf.mxu2  ;;  %v4100_v52 = vadd.f32 %v2191_v55, %v2097_v0 }
 0x2bb   : > { %v1942_v45 = vadd.f32 %v1898_v54, %v1808_v60  ;;  %v2266_v54 = vadd.f32 %v2265_v38, %v4093_v57 }
 0x2bd   : > { %v2267_v58 = vadd.f32 %v2266_v54, %v4097_v27 }
 0x2be   : > { %v2194_v49 = vpop.f32.mrf.mxu0 }
 0x2bf   : > { %v2054_v31 = vpop.f32.mrf.mxu3  ;;  %v1769_v22 = vpop.f32.mrf.mxu1  ;;  %v2268_v11 = vadd.f32 %v2267_v58, %v4100_v52 }
 0x2c0   : > { %v1810_v62 = vadd.f32 %v1769_v22, %v3887_v20  ;;  %v2098_v29 = vadd.f32 %v2054_v31, %v1942_v45 }
 0x2c2   : > { %v1900_v17 = vpop.f32.mrf.mxu2  ;;  %v4103_v23 = vadd.f32 %v2194_v49, %v2098_v29 }
 0x2c3   : > { %v1943_v16 = vadd.f32 %v1900_v17, %v1809_v56 }
 0x2c4   : > { %v2269_v41 = vadd.f32 %v2268_v11, %v4103_v23 }
 0x2c6   : > { %v2196_v53 = vpop.f32.mrf.mxu0 }
 0x2c7   : > { %v2056_v40 = vpop.f32.mrf.mxu3  ;;  %v1771_v28 = vpop.f32.mrf.mxu1 }
 0x2c8   : > { %v2099_v14 = vadd.f32 %v2056_v40, %v1943_v16  ;;  %v1811_v20 = vadd.f32 %v1771_v28, %v3892_v8 }
 0x2ca   : > { %v1903_v5 = vpop.f32.mrf.mxu2  ;;  %v4107_v31 = vadd.f32 %v2196_v53, %v2099_v14 }
 0x2cb   : > { %v1944_v36 = vadd.f32 %v1903_v5, %v1810_v62 }
 0x2cc   : > { %v2270_v13 = vadd.f32 %v2269_v41, %v4107_v31 }
 0x2ce   : > { %v2199_v26 = vpop.f32.mrf.mxu0 }
 0x2cf   : > { %v2059_v61 = vpop.f32.mrf.mxu3  ;;  %v1774_v9 = vpop.f32.mrf.mxu1 }
 0x2d0   : > { %v2100_v59 = vadd.f32 %v2059_v61, %v1944_v36  ;;  %v1812_v8 = vadd.f32 %v1774_v9, %v3901_v51 }
 0x2d2   : > { %v1905_v22 = vpop.f32.mrf.mxu2  ;;  %v4110_v24 = vadd.f32 %v2199_v26, %v2100_v59 }
 0x2d3   : > { %v1945_v17 = vadd.f32 %v1905_v22, %v1811_v20 }
 0x2d4   : > { %v2271_v49 = vadd.f32 %v2270_v13, %v4110_v24 }
 0x2d6   : > { %v2201_v55 = vpop.f32.mrf.mxu0 }
 0x2d7   : > { %v2061_v44 = vpop.f32.mrf.mxu3  ;;  %v1776_v60 = vpop.f32.mrf.mxu1 }
 0x2d8   : > { %v2101_v40 = vadd.f32 %v2061_v44, %v1945_v17  ;;  %v1813_v35 = vadd.f32 %v1776_v60, %v3906_v63 }
 0x2da   : > { %v4114_v2 = vadd.f32 %v2201_v55, %v2101_v40  ;;  %v1908_v28 = vpop.f32.mrf.mxu2 }
 0x2db   : > { %v1946_v7 = vadd.f32 %v1908_v28, %v1812_v8 }
 0x2dc   : > { %v2272_v53 = vadd.f32 %v2271_v49, %v4114_v2 }
 0x2de   : > { %v2204_v25 = vpop.f32.mrf.mxu0 }
 0x2df   : > { %v2064_v45 = vpop.f32.mrf.mxu3  ;;  %v1779_v38 = vpop.f32.mrf.mxu1 }
 0x2e0   : > { %v2102_v56 = vadd.f32 %v2064_v45, %v1946_v7  ;;  %v1814_v51 = vadd.f32 %v1779_v38, %v3916_v6 }
 0x2e2   : > { %v2242_v5 = vadd.f32 %v2204_v25, %v2102_v56  ;;  %v1910_v0 = vpop.f32.mrf.mxu2 }
 0x2e3   : > { %v1947_v62 = vadd.f32 %v1910_v0, %v1813_v35 }
 0x2e4   : > { %v2273_v16 = vadd.f32 %v2272_v53, %v2242_v5 }
 0x2e6   : > { %v2206_v29 = vpop.f32.mrf.mxu0 }
 0x2e7   : > { %v2066_v26 = vpop.f32.mrf.mxu3  ;;  %v1781_v58 = vpop.f32.mrf.mxu1 }
 0x2e8   : > { %v2103_v36 = vadd.f32 %v2066_v26, %v1947_v62  ;;  %v1815_v11 = vadd.f32 %v1781_v58, %v3921_v18 }
 0x2ea   : > { %v2243_v61 = vadd.f32 %v2206_v29, %v2103_v36  ;;  %v1913_v54 = vpop.f32.mrf.mxu2 }
 0x2eb   : > { %v1948_v9 = vadd.f32 %v1913_v54, %v1814_v51 }
 0x2ec   : > { %v2274_v14 = vadd.f32 %v2273_v16, %v2243_v61 }
 0x2ee   : > { %v2209_v59 = vpop.f32.mrf.mxu0 }
 0x2ef   : > { %v2069_v20 = vpop.f32.mrf.mxu3 }
 0x2f0   : > { %v2104_v22 = vadd.f32 %v2069_v20, %v1948_v9 }
 0x2f2   : > { %v2244_v63 = vadd.f32 %v2209_v59, %v2104_v22  ;;  %v1915_v17 = vpop.f32.mrf.mxu2 }
 0x2f3   : > { %v1949_v55 = vadd.f32 %v1915_v17, %v1815_v11 }
 0x2f4   : > { %v2275_v41 = vadd.f32 %v2274_v14, %v2244_v63 }
 0x2f6   : > { %v2211_v40 = vpop.f32.mrf.mxu0 }
 0x2f7   : > { %v2071_v44 = vpop.f32.mrf.mxu3 }
 0x2f8   : > { %v2105_v13 = vadd.f32 %v2071_v44, %v1949_v55 }
 0x2fa   : > { %v2245_v49 = vadd.f32 %v2211_v40, %v2105_v13 }
 0x2fc   : > { %v2276_v6 = vadd.f32 %v2275_v41, %v2245_v49 }
 0x2fe   : > { %v2277_v8 = vrot.slane %v2276_v6, 4 }
 0x300   : > { %v2278_v28 = vadd.f32 %v2277_v8, %v2276_v6 }
 0x302   : > { %v2279_v60 = vrot.slane %v2278_v28, 2 }
 0x304   : > { %v2280_v53 = vadd.f32 %v2279_v60, %v2278_v28 }
 0x306   : > { %v2281_v18 = vrot.slane %v2280_v53, 1 }
 0x308   : > { %v2282_v7 = vadd.f32 %v2281_v18, %v2280_v53 }
 0x30a   : > { %v4129_v25 = vmul.f32 0.00390625, %v2282_v7 }
 0x30c   : > { %2316 = vst [vmem:[%s166_s6] sm:$0x1] %v4129_v25 }
 0x30d   : > { %2850 = shalt.err (!%p2847_p3)
}
 0x30e   : > { %2771 = dma.vmem_to_hbm [thread:$0]  (%p2977_p5), %s2403_s7, 16, %s2405_s8, %s2388_s9   ;;  %v4145_v45 = vsub.f32 %v4110_v24, %v4129_v25  ;;  %v4149_v56 = vsub.f32 %v4114_v2, %v4129_v25  ;;  %v4152_v35 = vsub.f32 %v2242_v5, %v4129_v25  ;;  %v4155_v0 = vsub.f32 %v2243_v61, %v4129_v25 }
 0x30f   : > { %v4158_v16 = vsub.f32 %v2244_v63, %v4129_v25  ;;  %v4161_v62 = vsub.f32 %v2245_v49, %v4129_v25  ;;  %v2284_v24 = vsub.f32 %v3928_v42, %v4129_v25  ;;  %v2285_v38 = vsub.f32 %v3935_v21, %v4129_v25  ;;  %v4406_v49 = vld [vmem:[#allocation18_spill] sm:$0xff]  ;;  %s2413_s28 = scalar_lea.hbm %s4263_s3, %s2960_s16  ;;  %s172_s30 = scalar_lea.vmem [#allocation4], %s4122_s29 }
 0x310   : > { %v2286_v2 = vsub.f32 %v3942_v50, %v4129_v25  ;;  %v2287_v26 = vsub.f32 %v3949_v10, %v4129_v25  ;;  %v2288_v36 = vsub.f32 %v3956_v43, %v4129_v25  ;;  %v2289_v54 = vsub.f32 %v3963_v19, %v4129_v25  ;;  %s2415_s4 = sshll.u32 %s172_s30, 4  ;;  %s2417_s5 = sshll.u32 %s2413_s28, 4  ;;  %s2416_s4 = int_to_ptr.vmem [resolvable:$true] %s2415_s4  ;;  %s2418_s5 = int_to_ptr.hbm [resolvable:$true] %s2417_s5 }
 0x311   : > { %v2317_v5 = vmul.f32 %v2284_v24, %v2284_v24  ;;  %v2318_v29 = vmul.f32 %v2285_v38, %v2285_v38  ;;  %v2290_v21 = vsub.f32 %v3970_v1, %v4129_v25  ;;  %v2291_v58 = vsub.f32 %v3977_v37, %v4129_v25  ;;  %s2392_s6 = scalar_lea.sflag [#allocation5], %s4122_s29  ;;  %s2865_s7 = sshra.s32 %s2418_s5, 4  ;;  %s2866_s7 = int_to_ptr.hbm [resolvable:$true] %s2865_s7 }
 0x312   : > { %v2319_v61 = vmul.f32 %v2286_v2, %v2286_v2  ;;  %v2320_v42 = vmul.f32 %v2287_v26, %v2287_v26  ;;  %v2321_v9 = vmul.f32 %v2288_v36, %v2288_v36  ;;  %v2322_v59 = vmul.f32 %v2289_v54, %v2289_v54  ;;  %s2867_s8 = scalar_lea.hbm %s2866_s7, 1  ;;  %s2871_s16 = scalar_lea.hbm %s4263_s3, 2 }
 0x313   : > { %v2349_v51 = vadd.f32 %v2318_v29, %v2317_v5  ;;  %v2292_v43 = vsub.f32 %v3984_v39, %v4129_v25  ;;  %v2323_v20 = vmul.f32 %v2290_v21, %v2290_v21  ;;  %v2293_v19 = vsub.f32 %v3991_v12, %v4129_v25  ;;  %p2868_p4 = scmp.ne.s32.totalorder %s2866_s7, %s2867_s8  ;;  %p2872_p9 = scmp.lt.s32.totalorder %s2866_s7, %s4263_s3 }
 0x314   : > { %v2324_v63 = vmul.f32 %v2291_v58, %v2291_v58  ;;  %v2294_v1 = vsub.f32 %v4010_v3, %v4129_v25  ;;  %v2295_v37 = vsub.f32 %v4023_v47, %v4129_v25  ;;  %v2296_v39 = vsub.f32 %v4034_v4, %v4129_v25  ;;  %p2873_p10 = scmp.lt.s32.totalorder %s2871_s16, %s2867_s8 }
 0x315   : > { %v2350_v14 = vadd.f32 %v2349_v51, %v2319_v61  ;;  %v2325_v17 = vmul.f32 %v2292_v43, %v2292_v43  ;;  %v2326_v55 = vmul.f32 %v2293_v19, %v2293_v19  ;;  %v2297_v12 = vsub.f32 %v4406_v49, %v4129_v25  ;;  %p2869_p7 = pnand %p2868_p4, %p2977_p5 }
 0x316   : > { %v2327_v13 = vmul.f32 %v2294_v1, %v2294_v1  ;;  %v2328_v6 = vmul.f32 %v2295_v37, %v2295_v37  ;;  %v2298_v3 = vsub.f32 %v4050_v15, %v4129_v25  ;;  %v2329_v28 = vmul.f32 %v2296_v39, %v2296_v39  ;;  %p2874_p11 = por %p2873_p10, %p2872_p9 }
 0x317   : > { %v2351_v50 = vadd.f32 %v2350_v14, %v2320_v42  ;;  %v2299_v47 = vsub.f32 %v4053_v34, %v4129_v25  ;;  %v2330_v53 = vmul.f32 %v2297_v12, %v2297_v12  ;;  %v2300_v4 = vsub.f32 %v4056_v46, %v4129_v25  ;;  %p2870_p8 = pneg %p2869_p7 }
 0x318   : > { %v2331_v7 = vmul.f32 %v2298_v3, %v2298_v3  ;;  %v2301_v38 = vsub.f32 %v4059_v30, %v4129_v25  ;;  %v2302_v15 = vsub.f32 %v4062_v33, %v4129_v25  ;;  %v2303_v34 = vsub.f32 %v4064_v48, %v4129_v25 }
 0x319   : > { %v2352_v10 = vadd.f32 %v2351_v50, %v2321_v9  ;;  %v2332_v2 = vmul.f32 %v2299_v47, %v2299_v47  ;;  %v2333_v29 = vmul.f32 %v2300_v4, %v2300_v4  ;;  %v2304_v46 = vsub.f32 %v4066_v32, %v4129_v25  ;;  %p2875_p12 = pnand %p2874_p11, %p2870_p8 }
 0x31a   : > { %v2334_v36 = vmul.f32 %v2301_v38, %v2301_v38  ;;  %v2335_v51 = vmul.f32 %v2302_v15, %v2302_v15  ;;  %v2305_v30 = vsub.f32 %v4093_v57, %v4129_v25  ;;  %v2336_v42 = vmul.f32 %v2303_v34, %v2303_v34 }
 0x31b   : > { %v2353_v22 = vadd.f32 %v2352_v10, %v2322_v59  ;;  %v2306_v33 = vsub.f32 %v4097_v27, %v4129_v25  ;;  %v2337_v21 = vmul.f32 %v2304_v46, %v2304_v46  ;;  %v2307_v48 = vsub.f32 %v4100_v52, %v4129_v25 }
 0x31c   : > { %v2338_v50 = vmul.f32 %v2305_v30, %v2305_v30  ;;  %v2308_v32 = vsub.f32 %v4103_v23, %v4129_v25  ;;  %v2309_v57 = vsub.f32 %v4107_v31, %v4129_v25  ;;  %v2344_v1 = vmul.f32 %v4149_v56, %v4149_v56 }
 0x31d   : > { %v2354_v11 = vadd.f32 %v2353_v22, %v2323_v20  ;;  %v2339_v59 = vmul.f32 %v2306_v33, %v2306_v33  ;;  %v2340_v43 = vmul.f32 %v2307_v48, %v2307_v48  ;;  %v2346_v25 = vmul.f32 %v4155_v0, %v4155_v0 }
 0x31e   : > { %v2341_v22 = vmul.f32 %v2308_v32, %v2308_v32  ;;  %v2342_v27 = vmul.f32 %v2309_v57, %v2309_v57  ;;  %v2347_v37 = vmul.f32 %v4158_v16, %v4158_v16 }
 0x31f   : > { %v2355_v41 = vadd.f32 %v2354_v11, %v2324_v63  ;;  %v2343_v11 = vmul.f32 %v4145_v45, %v4145_v45  ;;  %v2348_v45 = vmul.f32 %v4161_v62, %v4161_v62 }
 0x321   : > { %v2356_v44 = vadd.f32 %v2355_v41, %v2325_v17  ;;  %v2345_v17 = vmul.f32 %v4152_v35, %v4152_v35 }
 0x323   : > { %v2357_v40 = vadd.f32 %v2356_v44, %v2326_v55 }
 0x325   : > { %v2358_v8 = vadd.f32 %v2357_v40, %v2327_v13 }
 0x327   : > { %v2359_v60 = vadd.f32 %v2358_v8, %v2328_v6 }
 0x329   : > { %v2360_v18 = vadd.f32 %v2359_v60, %v2329_v28 }
 0x32b   : > { %v2361_v24 = vadd.f32 %v2360_v18, %v2330_v53 }
 0x32d   : > { %v2362_v5 = vadd.f32 %v2361_v24, %v2331_v7 }
 0x32f   : > { %v2363_v26 = vadd.f32 %v2362_v5, %v2332_v2 }
 0x331   : > { %v2364_v61 = vadd.f32 %v2363_v26, %v2333_v29 }
 0x333   : > { %v2365_v54 = vadd.f32 %v2364_v61, %v2334_v36 }
 0x335   : > { %v2366_v14 = vadd.f32 %v2365_v54, %v2335_v51 }
 0x337   : > { %v2367_v9 = vadd.f32 %v2366_v14, %v2336_v42 }
 0x339   : > { %v2368_v58 = vadd.f32 %v2367_v9, %v2337_v21 }
 0x33b   : > { %v2369_v10 = vadd.f32 %v2368_v58, %v2338_v50 }
 0x33d   : > { %v2370_v20 = vadd.f32 %v2369_v10, %v2339_v59 }
 0x33f   : > { %v2371_v19 = vadd.f32 %v2370_v20, %v2340_v43 }
 0x341   : > { %v2372_v63 = vadd.f32 %v2371_v19, %v2341_v22 }
 0x343   : > { %v2373_v52 = vadd.f32 %v2372_v63, %v2342_v27 }
 0x345   : > { %v2374_v23 = vadd.f32 %v2373_v52, %v2343_v11 }
 0x347   : > { %v2375_v31 = vadd.f32 %v2374_v23, %v2344_v1 }
 0x349   : > { %v2376_v41 = vadd.f32 %v2375_v31, %v2345_v17 }
 0x34b   : > { %v2377_v55 = vadd.f32 %v2376_v41, %v2346_v25 }
 0x34d   : > { %v2378_v44 = vadd.f32 %v2377_v55, %v2347_v37 }
 0x34f   : > { %v2379_v56 = vadd.f32 %v2378_v44, %v2348_v45 }
 0x351   : > { %v2380_v39 = vrot.slane %v2379_v56, 4 }
 0x353   : > { %v2381_v13 = vadd.f32 %v2380_v39, %v2379_v56 }
 0x355   : > { %v2382_v40 = vrot.slane %v2381_v13, 2 }
 0x357   : > { %v2383_v35 = vadd.f32 %v2382_v40, %v2381_v13 }
 0x359   : > { %v2384_v0 = vrot.slane %v2383_v35, 1 }
 0x35b   : > { %v2385_v16 = vadd.f32 %v2384_v0, %v2383_v35 }
 0x35d   : > { %2386 = vst [vmem:[%s172_s30] sm:$0x1] %v2385_v16 }
 0x35e   : > { %2878 = shalt.err (!%p2875_p12)
}
 0x35f   : > { %2772 = dma.vmem_to_hbm [thread:$0]  (%p2977_p5), %s2416_s4, 16, %s2418_s5, %s2392_s6  }
 0x360 PF: > { %p2782_p13 = scmp.ge.s32.totalorder %s2917_s15, 2  ;;  %s2429_s29 = sand.u32 1, %s2905_s12  }
 0x361   : > { %s2430_s19 = scalar_lea.sflag [#allocation3], %s2429_s29 }
 0x362   : > { %p2776_p0 = pnand %p2782_p13, %p2981_p6 }
 0x364   : > { %p2777_p1 = pneg %p2776_p0 }
 0x366   : > { %2896 = dma.done.wait (%p2777_p1), %s2430_s19, 16  }
 0x367   : > { %2898 = vsyncadd (%p2777_p1), %s2430_s19, 4294967280  ;;  %s2439_s20 = scalar_lea.sflag [#allocation5], %s2429_s29 }
 0x368   : > { %2900 = dma.done.wait (%p2777_p1), %s2439_s20, 16  }
 0x369   : > { %2902 = vsyncadd (%p2777_p1), %s2439_s20, 4294967280  ;;  %p17_p5 = scmp.ge.s32.totalorder %s2964_s18, 4   ;;  %s4407_s12 = smov %s2909_s13 }
 0x36a   : > { %s4408_s13 = smov %s2913_s14  ;;  %s4409_s14 = smov %s2975_s21 }
 0x36b   : > { %s4410_s15 = smov %s2964_s18  ;;  %19 = sbr.rel (!%p17_p5) target bundleno = 5 (0x5), region = 88 }
 0x370   :  { %2444 = vsyncpa [#allocation3], 1 }
 0x371   :  { %2446 = vsyncpa [#allocation3 + $0x1], 1 }
 0x372   :  { %2447 = vsyncpa [#allocation5], 1 }
 0x373   :  { %2449 = vsyncpa [#allocation5 + $0x1], 1 }

</bundles_post_ra>
